<compile_context>
chip_gen: v7x
topology: tpu7x:2x2x1
jax: 0.10.0
libtpu: 0.0.40
codegen_flags: <defaults>
</compile_context>

<pallas_src>
import functools

import jax
import jax.numpy as jnp
from jax import lax
from jax.experimental import pallas as pl
from jax.experimental.pallas import tpu as pltpu


# ----------------------------------------------------------------------------
# math helpers usable inside Pallas kernels
# ----------------------------------------------------------------------------
def _erf_approx(x):
    # Abramowitz & Stegun 7.1.26, |err| <= 1.5e-7 (~f32 precision). Only needs
    # exp/mul/add/where, so it lowers cleanly in Mosaic.
    a1, a2, a3, a4, a5 = 0.254829592, -0.284496736, 1.421413741, -1.453152027, 1.061405429
    p = 0.3275911
    ax = jnp.abs(x)
    t = 1.0 / (1.0 + p * ax)
    poly = ((((a5 * t + a4) * t + a3) * t + a2) * t + a1) * t
    y = 1.0 - poly * jnp.exp(-ax * ax)
    return jnp.where(x >= 0, y, -y)


def _gelu(x):
    # torch.nn.GELU() default = exact erf formulation.
    return 0.5 * x * (1.0 + _erf_approx(x * 0.7071067811865476))


# ----------------------------------------------------------------------------
# Kernel 1: ScoreNet (one grid step per batch element)
# ----------------------------------------------------------------------------
def _scorenet_kernel(patches_ref, conv_w_ref, vecs_ref, in_w_ref, w1_ref, w2_ref,
                     w3_ref, score_ref, *, T, HW, C):
    # packed tiny 1-D params: rows = [conv_scale, conv_shift, ln_g, ln_b, in_b, b1, b2, b3]
    vecs = vecs_ref[...]                       # (8, 2C)
    scale = vecs[0:1, :C]
    shift = vecs[1:2, :C]
    ln_g = vecs[2:3, :]
    ln_b = vecs[3:4, :]
    in_b = vecs[4:5, :]
    b1 = vecs[5:6, :C]
    b2 = vecs[6:7, :C // 2]
    b3 = vecs[7:8, :1]

    # Conv3d(1x3x3, stride (1,2,2)) + folded BN as ONE im2col matmul over all T frames.
    p = patches_ref[0]                         # (T*HW, C*KH*KW)
    conv = jnp.dot(p, conv_w_ref[...], preferred_element_type=jnp.float32)
    conv = conv * scale + shift                # (T*HW, C)

    # Per-frame spatial mean / max pooling via group masks (layout-safe: no
    # reshape of the (T*HW, C) value is needed).
    R = T * HW
    row_id = lax.broadcasted_iota(jnp.int32, (T, R, C), 1)
    frm_id = lax.broadcasted_iota(jnp.int32, (T, R, C), 0)
    grp = (row_id >= frm_id * HW) & (row_id < (frm_id + 1) * HW)     # (T, R, C)
    cb = conv[None]                                                   # (1, R, C)
    avg = jnp.sum(jnp.where(grp, cb, 0.0), axis=1) * (1.0 / HW)       # (T, C)
    mx = jnp.max(jnp.where(grp, cb, -jnp.inf), axis=1)                # (T, C)
    x = jnp.concatenate([avg, mx], axis=-1)                           # (T, 2C)

    # in_conv: LayerNorm(2C) -> Linear(2C, 2C) -> GELU
    mu = jnp.mean(x, axis=-1, keepdims=True)
    var = jnp.mean(jnp.square(x - mu), axis=-1, keepdims=True)
    x = (x - mu) * lax.rsqrt(var + 1e-5)
    x = x * ln_g + ln_b
    x = _gelu(jnp.dot(x, in_w_ref[...], preferred_element_type=jnp.float32) + in_b)

    # local / global feature mixing
    local_x = x[:, :C]
    global_x = jnp.mean(x[:, C:], axis=0, keepdims=True)              # (1, C)
    x = jnp.concatenate([local_x, jnp.broadcast_to(global_x, (T, C))], axis=-1)

    # out_conv: Linear(2C,C) GELU Linear(C,C//2) GELU Linear(C//2,1)
    x = _gelu(jnp.dot(x, w1_ref[...], preferred_element_type=jnp.float32) + b1)
    x = _gelu(jnp.dot(x, w2_ref[...], preferred_element_type=jnp.float32) + b2)
    s = jnp.dot(x, w3_ref[...], preferred_element_type=jnp.float32) + b3    # (T, 1)

    # (T, 1) -> lane-dense (1, T) row without a transpose op (masked diag-sum)
    rr = lax.broadcasted_iota(jnp.int32, (T, T), 0)
    cc = lax.broadcasted_iota(jnp.int32, (T, T), 1)
    s_row = jnp.sum(jnp.where(rr == cc, s, 0.0), axis=0, keepdims=True)     # (1, T)

    # min_max_norm over the T axis
    smin = jnp.min(s_row, axis=-1, keepdims=True)
    smax = jnp.max(s_row, axis=-1, keepdims=True)
    score_ref[0] = (s_row - smin) / (smax - smin + 1e-5)                    # (1, T)


def scorenet_scores(patches_flat, conv_w_mat, vec_pack, in_w, w1, w2, w3, *, T, HW, C):
    B, R, CK = patches_flat.shape
    D2 = 2 * C

    def full2d(shape):
        return pl.BlockSpec(shape, lambda b: (0, 0))

    out = pl.pallas_call(
        functools.partial(_scorenet_kernel, T=T, HW=HW, C=C),
        out_shape=jax.ShapeDtypeStruct((B, 1, T), jnp.float32),
        grid=(B,),
        in_specs=[
            pl.BlockSpec((1, R, CK), lambda b: (b, 0, 0)),
            full2d((CK, C)),
            full2d((8, D2)),          # packed scale/shift/ln/biases
            full2d((D2, D2)),
            full2d((D2, C)),
            full2d((C, C // 2)),
            full2d((C // 2, 1)),
        ],
        out_specs=pl.BlockSpec((1, 1, T), lambda b: (b, 0, 0)),
        compiler_params=pltpu.CompilerParams(dimension_semantics=("parallel",)),
    )(patches_flat, conv_w_mat, vec_pack, in_w, w1, w2, w3)
    return out[:, 0, :]                                   # (B, T)


# ----------------------------------------------------------------------------
# Kernel 2: fused indicator construction + extraction bmm
#   idx_all : (B, T, n) int32  (rows 0..k-1 = top-k indices, rows k..T-1 = back)
#   frames  : (B, T, D) float32
#   out[b, j, :] = sum_t mean_n 1[idx_all[b, j, n] == t] * frames[b, t, :]
# ----------------------------------------------------------------------------
def _ind_extract_kernel(idx_ref, frames_ref, out_ref, *, n_samples, T):
    idx = idx_ref[0]                                            # (T, n)
    ids = lax.broadcasted_iota(jnp.int32, (T, T, n_samples), 1)
    onehot = (idx[:, None, :] == ids).astype(jnp.float32)       # (T, T, n)
    ind = jnp.sum(onehot, axis=-1) * (1.0 / n_samples)          # (T, T)
    out_ref[0] = jnp.dot(ind, frames_ref[0],
                         preferred_element_type=jnp.float32).astype(out_ref.dtype)


def _pick_dtile(D, cap=2048):
    """Largest multiple-of-128 divisor of D that is <= cap (or D itself)."""
    if D <= cap:
        return D
    for t in range(cap, 127, -128):
        if D % t == 0:
            return t
    return D


def indicator_extract(idx_all, frames_flat):
    B, T, n = idx_all.shape
    D = frames_flat.shape[-1]
    dt = _pick_dtile(D)
    nd = D // dt
    return pl.pallas_call(
        functools.partial(_ind_extract_kernel, n_samples=n, T=T),
        out_shape=jax.ShapeDtypeStruct((B, T, D), frames_flat.dtype),
        grid=(B, nd),
        in_specs=[pl.BlockSpec((1, T, n), lambda b, d: (b, 0, 0)),
                  pl.BlockSpec((1, T, dt), lambda b, d: (b, 0, d))],
        out_specs=pl.BlockSpec((1, T, dt), lambda b, d: (b, 0, d)),
        compiler_params=pltpu.CompilerParams(
            dimension_semantics=("parallel", "parallel")),
    )(idx_all.astype(jnp.int32), frames_flat)


# ----------------------------------------------------------------------------
# glue: im2col, params, forward wrapper
# ----------------------------------------------------------------------------
def im2col(frames, kh=3, kw=3, sh=2, sw=2):
    """(B,C,T,H,W) -> patches (B, T, Ho*Wo, C*kh*kw) matching torch Conv3d weight order."""
    B, C, T, H, W = frames.shape
    Ho = (H - kh) // sh + 1
    Wo = (W - kw) // sw + 1
    cols = []
    for i in range(kh):
        for j in range(kw):
            sl = frames[:, :, :, i:i + sh * (Ho - 1) + 1:sh, j:j + sw * (Wo - 1) + 1:sw]
            cols.append(sl)                            # (B, C, T, Ho, Wo)
    p = jnp.stack(cols, axis=2)                        # (B, C, kh*kw, T, Ho, Wo)
    p = jnp.transpose(p, (0, 3, 4, 5, 1, 2))           # (B, T, Ho, Wo, C, kh*kw)
    return p.reshape(B, T, Ho * Wo, C * kh * kw), Ho, Wo


def init_params(key, C):
    """Deterministic synthetic init (the original applies an external weight_init)."""
    D2 = 2 * C
    ks = jax.random.split(key, 10)

    def lin_w(k, fan_in, fan_out):
        return jax.random.normal(k, (fan_in, fan_out), jnp.float32) / jnp.sqrt(float(fan_in))

    return dict(
        conv_w=jax.random.normal(ks[0], (C, C, 1, 3, 3), jnp.float32) / jnp.sqrt(9.0 * C),
        conv_b=0.1 * jax.random.normal(ks[1], (C,), jnp.float32),
        bn_gamma=jnp.ones((C,), jnp.float32), bn_beta=jnp.zeros((C,), jnp.float32),
        bn_mean=jnp.zeros((C,), jnp.float32), bn_var=jnp.ones((C,), jnp.float32),
        ln_g=jnp.ones((D2,), jnp.float32), ln_b=jnp.zeros((D2,), jnp.float32),
        in_w=lin_w(ks[2], D2, D2), in_b=0.1 * jax.random.normal(ks[3], (D2,), jnp.float32),
        w1=lin_w(ks[4], D2, C), b1=0.1 * jax.random.normal(ks[5], (C,), jnp.float32),
        w2=lin_w(ks[6], C, C // 2), b2=0.1 * jax.random.normal(ks[7], (C // 2,), jnp.float32),
        w3=lin_w(ks[8], C // 2, 1), b3=0.1 * jax.random.normal(ks[9], (1,), jnp.float32),
    )


def perturbed_rank_forward(frames, params, k, *, training=False, num_samples=1000,
                           sigma=0.05, noise_key=None, return_aux=False):
    B, C, T, H, W = frames.shape
    D2 = 2 * C

    # ---- ScoreNet (Pallas kernel 1) ----
    patches4, Ho, Wo = im2col(frames)                 # (B, T, HW, CK)
    HW = Ho * Wo
    CK = patches4.shape[-1]
    patches = patches4.reshape(B, T * HW, CK)         # one big matmul M = T*HW

    bn_s = params["bn_gamma"] / jnp.sqrt(params["bn_var"] + 1e-5)
    conv_scale = bn_s
    conv_shift = (params["conv_b"] - params["bn_mean"]) * bn_s + params["bn_beta"]
    conv_w_mat = params["conv_w"].reshape(C, C * 9).T            # (CK, C)

    def padrow(v):
        return jnp.pad(v, (0, D2 - v.shape[0]))

    vec_pack = jnp.stack([
        padrow(conv_scale), padrow(conv_shift),
        params["ln_g"], params["ln_b"], params["in_b"],
        padrow(params["b1"]), padrow(params["b2"]), padrow(params["b3"]),
    ], axis=0).astype(jnp.float32)                                # (8, 2C)

    scores = scorenet_scores(patches, conv_w_mat, vec_pack,
                             params["in_w"], params["w1"], params["w2"], params["w3"],
                             T=T, HW=HW, C=C)                     # (B, T)

    # frames: 'b c t h w -> b t (h w c)'
    frames_flat = jnp.transpose(frames, (0, 2, 3, 4, 1)).reshape(B, T, H * W * C)

    if training:
        # PerturbedRankFunction.forward (noise / topk / sort in JAX glue)
        noise = jax.random.normal(noise_key, (B, num_samples, T), jnp.float32)
        perturbed = scores[:, None, :] + noise * sigma
        order_desc = jnp.argsort(-perturbed, axis=-1)             # (B, n, T)
        idx_topk = jnp.sort(order_desc[..., :k], axis=-1)         # (B, n, k)
        idx_back = jnp.sort(order_desc[..., k:], axis=-1)         # (B, n, T-k)
        idx_all = jnp.transpose(jnp.concatenate([idx_topk, idx_back], axis=-1),
                                (0, 2, 1))                        # (B, T, n)
        eval_idx = (None, None)
    else:
        order_desc = jnp.argsort(-scores, axis=-1)                # (B, T)
        idx_topk = jnp.sort(order_desc[:, :k], axis=-1)           # (B, k)
        idx_back = jnp.sort(order_desc[:, k:], axis=-1)           # (B, T-k)
        idx_all = jnp.concatenate([idx_topk, idx_back], axis=-1)[:, :, None]  # (B, T, 1)
        eval_idx = (idx_topk, idx_back)

    # ---- fused indicator + extraction (Pallas kernel 2) ----
    # frames_flat is streamed from HBM once for BOTH top-k and back frames.
    extracted = indicator_extract(idx_all, frames_flat)           # (B, T, D)
    frames_topk = extracted[:, :k]                                # (B, k,   H*W*C)
    frames_back = extracted[:, k:]                                # (B, T-k, H*W*C)

    sorted_inds = jnp.argsort(scores, axis=1)                     # (B, T)

    # 'b k (h w c) -> b c k h w'
    frames_topk = jnp.transpose(frames_topk.reshape(B, k, H, W, C), (0, 4, 1, 2, 3))
    frames_back = jnp.transpose(frames_back.reshape(B, T - k, H, W, C), (0, 4, 1, 2, 3))

    if return_aux:
        aux = dict(scores=scores, idx_topk=eval_idx[0], idx_back=eval_idx[1])
        return frames_topk, frames_back, sorted_inds, aux
    return frames_topk, frames_back, sorted_inds


# ----------------------------------------------------------------------------
# pure-JAX reference for the ScoreNet scores (sanity check only)
# ----------------------------------------------------------------------------
def scores_reference(frames, params):
    B, C, T, H, W = frames.shape
    patches, _, _ = im2col(frames)
    conv = jnp.einsum("bthk,kc->bthc", patches, params["conv_w"].reshape(C, C * 9).T)
    conv = conv + params["conv_b"]
    bn = (conv - params["bn_mean"]) / jnp.sqrt(params["bn_var"] + 1e-5) * params["bn_gamma"] + params["bn_beta"]
    x = jnp.concatenate([bn.mean(axis=2), bn.max(axis=2)], axis=-1)      # (B, T, 2C)
    mu = x.mean(-1, keepdims=True)
    var = ((x - mu) ** 2).mean(-1, keepdims=True)
    x = (x - mu) / jnp.sqrt(var + 1e-5) * params["ln_g"] + params["ln_b"]
    x = jax.nn.gelu(x @ params["in_w"] + params["in_b"], approximate=False)
    local = x[..., :C]
    glob = x[..., C:].mean(axis=1, keepdims=True)
    x = jnp.concatenate([local, jnp.broadcast_to(glob, (B, T, C))], axis=-1)
    x = jax.nn.gelu(x @ params["w1"] + params["b1"], approximate=False)
    x = jax.nn.gelu(x @ params["w2"] + params["b2"], approximate=False)
    s = (x @ params["w3"] + params["b3"])[..., 0]
    smin = s.min(-1, keepdims=True)
    smax = s.max(-1, keepdims=True)
    return (s - smin) / (smax - smin + 1e-5)


if __name__ == "__main__":
    B, C, T, H, W = 2, 8, 8, 16, 16      # embed_dim = C = 8
    k = 3
    key = jax.random.PRNGKey(0)
    k_frames, k_params, k_noise = jax.random.split(key, 3)
    frames = jax.random.normal(k_frames, (B, C, T, H, W), jnp.float32)
    params = init_params(k_params, C)

    # ---- eval / inference path (deterministic, exact one-hot extraction) ----
    ftk, fbk, sinds, aux = perturbed_rank_forward(frames, params, k,
                                                  training=False, return_aux=True)
    jax.block_until_ready((ftk, fbk, sinds))
    assert ftk.shape == (B, C, k, H, W)
    assert fbk.shape == (B, C, T - k, H, W)
    assert sinds.shape == (B, T)

    # sanity: scores vs pure-JAX reference
    scores_ref = scores_reference(frames, params)
    assert bool(jnp.allclose(aux["scores"], scores_ref, atol=5e-2)), "score mismatch"

    # sanity: eval extraction == direct gather along T (top-k and back)
    frames_flat = jnp.transpose(frames, (0, 2, 3, 4, 1)).reshape(B, T, H * W * C)
    gathered_t = jnp.take_along_axis(frames_flat, aux["idx_topk"][..., None], axis=1)
    topk_flat = jnp.transpose(ftk, (0, 2, 3, 4, 1)).reshape(B, k, H * W * C)
    assert bool(jnp.allclose(topk_flat, gathered_t, atol=1e-4)), "topk gather mismatch"
    gathered_b = jnp.take_along_axis(frames_flat, aux["idx_back"][..., None], axis=1)
    back_flat = jnp.transpose(fbk, (0, 2, 3, 4, 1)).reshape(B, T - k, H * W * C)
    assert bool(jnp.allclose(back_flat, gathered_b, atol=1e-4)), "back gather mismatch"

    # ---- training path: perturbed-ranking averaged indicators (n = 128 samples) ----
    ftk2, fbk2, sinds2 = perturbed_rank_forward(frames, params, k, training=True,
                                                num_samples=128, sigma=0.05,
                                                noise_key=k_noise)
    jax.block_until_ready((ftk2, fbk2, sinds2))
    assert ftk2.shape == (B, C, k, H, W)
    assert fbk2.shape == (B, C, T - k, H, W)

    print("KERNEL_OK")
</pallas_src>

<mosaic_0001>
module attributes {stable_mosaic.version = 11 : i64} {
  func.func @_scorenet_kernel(%arg0: i32, %arg1: memref<1x392x72xf32, #tpu.memory_space<vmem>>, %arg2: memref<72x8xf32, #tpu.memory_space<vmem>>, %arg3: memref<8x16xf32, #tpu.memory_space<vmem>>, %arg4: memref<16x16xf32, #tpu.memory_space<vmem>>, %arg5: memref<16x8xf32, #tpu.memory_space<vmem>>, %arg6: memref<8x4xf32, #tpu.memory_space<vmem>>, %arg7: memref<4x1xf32, #tpu.memory_space<vmem>>, %arg8: memref<1x1x8xf32, #tpu.memory_space<vmem>>) attributes {dimension_semantics = [#tpu.dimension_semantics<parallel>], iteration_bounds = array<i64: 2>, scalar_prefetch = 0 : i64, scratch_operands = 0 : i64, tpu.core_type = #tpu.core_type<tc>, window_params = [{transform_indices = @transform_0, window_bounds = array<i64: 1, 392, 72>}, {pipeline_mode = #tpu.pipeline_mode<synchronous>, transform_indices = @transform_1, window_bounds = array<i64: 72, 8>}, {pipeline_mode = #tpu.pipeline_mode<synchronous>, transform_indices = @transform_2, window_bounds = array<i64: 8, 16>}, {pipeline_mode = #tpu.pipeline_mode<synchronous>, transform_indices = @transform_3, window_bounds = array<i64: 16, 16>}, {pipeline_mode = #tpu.pipeline_mode<synchronous>, transform_indices = @transform_4, window_bounds = array<i64: 16, 8>}, {pipeline_mode = #tpu.pipeline_mode<synchronous>, transform_indices = @transform_5, window_bounds = array<i64: 8, 4>}, {pipeline_mode = #tpu.pipeline_mode<synchronous>, transform_indices = @transform_6, window_bounds = array<i64: 4, 1>}, {transform_indices = @transform_7, window_bounds = array<i64: 1, 1, 8>}]} {
    %c0 = arith.constant 0 : index
    %c0_0 = arith.constant 0 : index
    %0 = vector.load %arg3[%c0, %c0_0] : memref<8x16xf32, #tpu.memory_space<vmem>>, vector<8x16xf32>
    %1 = vector.extract_strided_slice %0 {offsets = [0, 0], sizes = [1, 8], strides = [1, 1]} : vector<8x16xf32> to vector<1x8xf32>
    %2 = vector.extract_strided_slice %0 {offsets = [1, 0], sizes = [1, 8], strides = [1, 1]} : vector<8x16xf32> to vector<1x8xf32>
    %3 = vector.extract_strided_slice %0 {offsets = [2, 0], sizes = [1, 16], strides = [1, 1]} : vector<8x16xf32> to vector<1x16xf32>
    %4 = vector.extract_strided_slice %0 {offsets = [3, 0], sizes = [1, 16], strides = [1, 1]} : vector<8x16xf32> to vector<1x16xf32>
    %5 = vector.extract_strided_slice %0 {offsets = [4, 0], sizes = [1, 16], strides = [1, 1]} : vector<8x16xf32> to vector<1x16xf32>
    %6 = vector.extract_strided_slice %0 {offsets = [5, 0], sizes = [1, 8], strides = [1, 1]} : vector<8x16xf32> to vector<1x8xf32>
    %7 = vector.extract_strided_slice %0 {offsets = [6, 0], sizes = [1, 4], strides = [1, 1]} : vector<8x16xf32> to vector<1x4xf32>
    %8 = vector.extract_strided_slice %0 {offsets = [7, 0], sizes = [1, 1], strides = [1, 1]} : vector<8x16xf32> to vector<1x1xf32>
    %c0_1 = arith.constant 0 : index
    %c0_2 = arith.constant 0 : index
    %c0_3 = arith.constant 0 : index
    %9 = vector.load %arg1[%c0_1, %c0_2, %c0_3] : memref<1x392x72xf32, #tpu.memory_space<vmem>>, vector<1x392x72xf32>
    %10 = vector.shape_cast %9 : vector<1x392x72xf32> to vector<392x72xf32>
    %c0_4 = arith.constant 0 : index
    %c0_5 = arith.constant 0 : index
    %11 = vector.load %arg2[%c0_4, %c0_5] : memref<72x8xf32, #tpu.memory_space<vmem>>, vector<72x8xf32>
    %cst = arith.constant dense<0.000000e+00> : vector<392x8xf32>
    %12 = tpu.matmul %10, %11, %cst {dimension_numbers = #tpu.dot_dimension_numbers<[1], [0], [0], [1], [0, 0, 1, 1], [], []>} : vector<392x72xf32>, vector<72x8xf32>, vector<392x8xf32> -> vector<392x8xf32>
    %13 = vector.broadcast %1 : vector<1x8xf32> to vector<392x8xf32>
    %14 = arith.mulf %12, %13 : vector<392x8xf32>
    %15 = vector.broadcast %2 : vector<1x8xf32> to vector<392x8xf32>
    %16 = arith.addf %14, %15 : vector<392x8xf32>
    %17 = tpu.iota {dimensions = array<i32: 1>} : vector<8x392x8xi32>
    %18 = tpu.iota {dimensions = array<i32: 0>} : vector<8x392x8xi32>
    %c49_i32 = arith.constant 49 : i32
    %19 = vector.broadcast %c49_i32 : i32 to vector<8x392x8xi32>
    %20 = arith.muli %18, %19 : vector<8x392x8xi32>
    %21 = arith.cmpi sge, %17, %20 : vector<8x392x8xi32>
    %c1_i32 = arith.constant 1 : i32
    %22 = vector.broadcast %c1_i32 : i32 to vector<8x392x8xi32>
    %23 = arith.addi %18, %22 : vector<8x392x8xi32>
    %c49_i32_6 = arith.constant 49 : i32
    %24 = vector.broadcast %c49_i32_6 : i32 to vector<8x392x8xi32>
    %25 = arith.muli %23, %24 : vector<8x392x8xi32>
    %26 = arith.cmpi slt, %17, %25 : vector<8x392x8xi32>
    %27 = arith.andi %21, %26 : vector<8x392x8xi1>
    %28 = vector.shape_cast %16 : vector<392x8xf32> to vector<1x392x8xf32>
    %cst_7 = arith.constant 0.000000e+00 : f32
    %29 = vector.shape_cast %28 : vector<1x392x8xf32> to vector<1x392x8xf32>
    %30 = vector.broadcast %29 : vector<1x392x8xf32> to vector<8x392x8xf32>
    %31 = vector.broadcast %cst_7 : f32 to vector<8x392x8xf32>
    %32 = arith.select %27, %30, %31 : vector<8x392x8xi1>, vector<8x392x8xf32>
    %cst_8 = arith.constant dense<0.000000e+00> : vector<8x8xf32>
    %33 = vector.multi_reduction <add>, %32, %cst_8 [1] : vector<8x392x8xf32> to vector<8x8xf32>
    %cst_9 = arith.constant 0.0204081628 : f32
    %34 = vector.broadcast %cst_9 : f32 to vector<8x8xf32>
    %35 = arith.mulf %33, %34 : vector<8x8xf32>
    %cst_10 = arith.constant 0xFF800000 : f32
    %36 = vector.shape_cast %28 : vector<1x392x8xf32> to vector<1x392x8xf32>
    %37 = vector.broadcast %36 : vector<1x392x8xf32> to vector<8x392x8xf32>
    %38 = vector.broadcast %cst_10 : f32 to vector<8x392x8xf32>
    %39 = arith.select %27, %37, %38 : vector<8x392x8xi1>, vector<8x392x8xf32>
    %cst_11 = arith.constant dense<0xFF800000> : vector<8x8xf32>
    %40 = vector.multi_reduction <maximumf>, %39, %cst_11 [1] : vector<8x392x8xf32> to vector<8x8xf32>
    %41 = tpu.concatenate %35, %40 in 1 : vector<8x8xf32>, vector<8x8xf32> -> vector<8x16xf32>
    %cst_12 = arith.constant dense<0.000000e+00> : vector<8xf32>
    %42 = vector.multi_reduction <add>, %41, %cst_12 [1] : vector<8x16xf32> to vector<8xf32>
    %43 = vector.shape_cast %42 : vector<8xf32> to vector<8x1xf32>
    %cst_13 = arith.constant 1.600000e+01 : f32
    %44 = vector.broadcast %cst_13 : f32 to vector<8x1xf32>
    %45 = arith.divf %43, %44 : vector<8x1xf32>
    %46 = vector.broadcast %45 : vector<8x1xf32> to vector<8x16xf32>
    %47 = arith.subf %41, %46 : vector<8x16xf32>
    %48 = arith.mulf %47, %47 : vector<8x16xf32>
    %cst_14 = arith.constant dense<0.000000e+00> : vector<8xf32>
    %49 = vector.multi_reduction <add>, %48, %cst_14 [1] : vector<8x16xf32> to vector<8xf32>
    %50 = vector.shape_cast %49 : vector<8xf32> to vector<8x1xf32>
    %cst_15 = arith.constant 1.600000e+01 : f32
    %51 = vector.broadcast %cst_15 : f32 to vector<8x1xf32>
    %52 = arith.divf %50, %51 : vector<8x1xf32>
    %53 = vector.broadcast %45 : vector<8x1xf32> to vector<8x16xf32>
    %54 = arith.subf %41, %53 : vector<8x16xf32>
    %cst_16 = arith.constant 9.99999974E-6 : f32
    %55 = vector.broadcast %cst_16 : f32 to vector<8x1xf32>
    %56 = arith.addf %52, %55 : vector<8x1xf32>
    %57 = math.rsqrt %56 : vector<8x1xf32>
    %58 = vector.broadcast %57 : vector<8x1xf32> to vector<8x16xf32>
    %59 = arith.mulf %54, %58 : vector<8x16xf32>
    %60 = vector.broadcast %3 : vector<1x16xf32> to vector<8x16xf32>
    %61 = arith.mulf %59, %60 : vector<8x16xf32>
    %62 = vector.broadcast %4 : vector<1x16xf32> to vector<8x16xf32>
    %63 = arith.addf %61, %62 : vector<8x16xf32>
    %c0_17 = arith.constant 0 : index
    %c0_18 = arith.constant 0 : index
    %64 = vector.load %arg4[%c0_17, %c0_18] : memref<16x16xf32, #tpu.memory_space<vmem>>, vector<16x16xf32>
    %cst_19 = arith.constant dense<0.000000e+00> : vector<8x16xf32>
    %65 = tpu.matmul %63, %64, %cst_19 {dimension_numbers = #tpu.dot_dimension_numbers<[1], [0], [0], [1], [0, 0, 1, 1], [], []>} : vector<8x16xf32>, vector<16x16xf32>, vector<8x16xf32> -> vector<8x16xf32>
    %66 = vector.broadcast %5 : vector<1x16xf32> to vector<8x16xf32>
    %67 = arith.addf %65, %66 : vector<8x16xf32>
    %cst_20 = arith.constant 5.000000e-01 : f32
    %68 = vector.broadcast %cst_20 : f32 to vector<8x16xf32>
    %69 = arith.mulf %68, %67 : vector<8x16xf32>
    %cst_21 = arith.constant 0.707106769 : f32
    %70 = vector.broadcast %cst_21 : f32 to vector<8x16xf32>
    %71 = arith.mulf %67, %70 : vector<8x16xf32>
    %72 = math.absf %71 : vector<8x16xf32>
    %cst_22 = arith.constant 0.327591091 : f32
    %73 = vector.broadcast %cst_22 : f32 to vector<8x16xf32>
    %74 = arith.mulf %73, %72 : vector<8x16xf32>
    %cst_23 = arith.constant 1.000000e+00 : f32
    %75 = vector.broadcast %cst_23 : f32 to vector<8x16xf32>
    %76 = arith.addf %75, %74 : vector<8x16xf32>
    %cst_24 = arith.constant 1.000000e+00 : f32
    %77 = vector.broadcast %cst_24 : f32 to vector<8x16xf32>
    %78 = arith.divf %77, %76 : vector<8x16xf32>
    %cst_25 = arith.constant 1.06140542 : f32
    %79 = vector.broadcast %cst_25 : f32 to vector<8x16xf32>
    %80 = arith.mulf %79, %78 : vector<8x16xf32>
    %cst_26 = arith.constant -1.45315206 : f32
    %81 = vector.broadcast %cst_26 : f32 to vector<8x16xf32>
    %82 = arith.addf %80, %81 : vector<8x16xf32>
    %83 = arith.mulf %82, %78 : vector<8x16xf32>
    %cst_27 = arith.constant 1.42141378 : f32
    %84 = vector.broadcast %cst_27 : f32 to vector<8x16xf32>
    %85 = arith.addf %83, %84 : vector<8x16xf32>
    %86 = arith.mulf %85, %78 : vector<8x16xf32>
    %cst_28 = arith.constant -0.284496725 : f32
    %87 = vector.broadcast %cst_28 : f32 to vector<8x16xf32>
    %88 = arith.addf %86, %87 : vector<8x16xf32>
    %89 = arith.mulf %88, %78 : vector<8x16xf32>
    %cst_29 = arith.constant 0.254829586 : f32
    %90 = vector.broadcast %cst_29 : f32 to vector<8x16xf32>
    %91 = arith.addf %89, %90 : vector<8x16xf32>
    %92 = arith.mulf %91, %78 : vector<8x16xf32>
    %cst_30 = arith.constant 0.000000e+00 : f32
    %93 = vector.broadcast %cst_30 : f32 to vector<8x16xf32>
    %94 = arith.subf %93, %72 : vector<8x16xf32>
    %95 = arith.mulf %94, %72 : vector<8x16xf32>
    %96 = math.exp %95 : vector<8x16xf32>
    %97 = arith.mulf %92, %96 : vector<8x16xf32>
    %cst_31 = arith.constant 1.000000e+00 : f32
    %98 = vector.broadcast %cst_31 : f32 to vector<8x16xf32>
    %99 = arith.subf %98, %97 : vector<8x16xf32>
    %cst_32 = arith.constant 0.000000e+00 : f32
    %100 = vector.broadcast %cst_32 : f32 to vector<8x16xf32>
    %101 = arith.cmpf oge, %71, %100 : vector<8x16xf32>
    %cst_33 = arith.constant 0.000000e+00 : f32
    %102 = vector.broadcast %cst_33 : f32 to vector<8x16xf32>
    %103 = arith.subf %102, %99 : vector<8x16xf32>
    %104 = arith.select %101, %99, %103 : vector<8x16xi1>, vector<8x16xf32>
    %cst_34 = arith.constant 1.000000e+00 : f32
    %105 = vector.broadcast %cst_34 : f32 to vector<8x16xf32>
    %106 = arith.addf %105, %104 : vector<8x16xf32>
    %107 = arith.mulf %69, %106 : vector<8x16xf32>
    %108 = vector.extract_strided_slice %107 {offsets = [0, 0], sizes = [8, 8], strides = [1, 1]} : vector<8x16xf32> to vector<8x8xf32>
    %109 = vector.extract_strided_slice %107 {offsets = [0, 8], sizes = [8, 8], strides = [1, 1]} : vector<8x16xf32> to vector<8x8xf32>
    %cst_35 = arith.constant dense<0.000000e+00> : vector<8xf32>
    %110 = vector.multi_reduction <add>, %109, %cst_35 [0] : vector<8x8xf32> to vector<8xf32>
    %111 = vector.shape_cast %110 : vector<8xf32> to vector<1x8xf32>
    %cst_36 = arith.constant 8.000000e+00 : f32
    %112 = vector.broadcast %cst_36 : f32 to vector<1x8xf32>
    %113 = arith.divf %111, %112 : vector<1x8xf32>
    %114 = vector.shape_cast %113 : vector<1x8xf32> to vector<1x8xf32>
    %115 = vector.broadcast %114 : vector<1x8xf32> to vector<8x8xf32>
    %116 = tpu.concatenate %108, %115 in 1 : vector<8x8xf32>, vector<8x8xf32> -> vector<8x16xf32>
    %c0_37 = arith.constant 0 : index
    %c0_38 = arith.constant 0 : index
    %117 = vector.load %arg5[%c0_37, %c0_38] : memref<16x8xf32, #tpu.memory_space<vmem>>, vector<16x8xf32>
    %cst_39 = arith.constant dense<0.000000e+00> : vector<8x8xf32>
    %118 = tpu.matmul %116, %117, %cst_39 {dimension_numbers = #tpu.dot_dimension_numbers<[1], [0], [0], [1], [0, 0, 1, 1], [], []>} : vector<8x16xf32>, vector<16x8xf32>, vector<8x8xf32> -> vector<8x8xf32>
    %119 = vector.broadcast %6 : vector<1x8xf32> to vector<8x8xf32>
    %120 = arith.addf %118, %119 : vector<8x8xf32>
    %cst_40 = arith.constant 5.000000e-01 : f32
    %121 = vector.broadcast %cst_40 : f32 to vector<8x8xf32>
    %122 = arith.mulf %121, %120 : vector<8x8xf32>
    %cst_41 = arith.constant 0.707106769 : f32
    %123 = vector.broadcast %cst_41 : f32 to vector<8x8xf32>
    %124 = arith.mulf %120, %123 : vector<8x8xf32>
    %125 = math.absf %124 : vector<8x8xf32>
    %cst_42 = arith.constant 0.327591091 : f32
    %126 = vector.broadcast %cst_42 : f32 to vector<8x8xf32>
    %127 = arith.mulf %126, %125 : vector<8x8xf32>
    %cst_43 = arith.constant 1.000000e+00 : f32
    %128 = vector.broadcast %cst_43 : f32 to vector<8x8xf32>
    %129 = arith.addf %128, %127 : vector<8x8xf32>
    %cst_44 = arith.constant 1.000000e+00 : f32
    %130 = vector.broadcast %cst_44 : f32 to vector<8x8xf32>
    %131 = arith.divf %130, %129 : vector<8x8xf32>
    %cst_45 = arith.constant 1.06140542 : f32
    %132 = vector.broadcast %cst_45 : f32 to vector<8x8xf32>
    %133 = arith.mulf %132, %131 : vector<8x8xf32>
    %cst_46 = arith.constant -1.45315206 : f32
    %134 = vector.broadcast %cst_46 : f32 to vector<8x8xf32>
    %135 = arith.addf %133, %134 : vector<8x8xf32>
    %136 = arith.mulf %135, %131 : vector<8x8xf32>
    %cst_47 = arith.constant 1.42141378 : f32
    %137 = vector.broadcast %cst_47 : f32 to vector<8x8xf32>
    %138 = arith.addf %136, %137 : vector<8x8xf32>
    %139 = arith.mulf %138, %131 : vector<8x8xf32>
    %cst_48 = arith.constant -0.284496725 : f32
    %140 = vector.broadcast %cst_48 : f32 to vector<8x8xf32>
    %141 = arith.addf %139, %140 : vector<8x8xf32>
    %142 = arith.mulf %141, %131 : vector<8x8xf32>
    %cst_49 = arith.constant 0.254829586 : f32
    %143 = vector.broadcast %cst_49 : f32 to vector<8x8xf32>
    %144 = arith.addf %142, %143 : vector<8x8xf32>
    %145 = arith.mulf %144, %131 : vector<8x8xf32>
    %cst_50 = arith.constant 0.000000e+00 : f32
    %146 = vector.broadcast %cst_50 : f32 to vector<8x8xf32>
    %147 = arith.subf %146, %125 : vector<8x8xf32>
    %148 = arith.mulf %147, %125 : vector<8x8xf32>
    %149 = math.exp %148 : vector<8x8xf32>
    %150 = arith.mulf %145, %149 : vector<8x8xf32>
    %cst_51 = arith.constant 1.000000e+00 : f32
    %151 = vector.broadcast %cst_51 : f32 to vector<8x8xf32>
    %152 = arith.subf %151, %150 : vector<8x8xf32>
    %cst_52 = arith.constant 0.000000e+00 : f32
    %153 = vector.broadcast %cst_52 : f32 to vector<8x8xf32>
    %154 = arith.cmpf oge, %124, %153 : vector<8x8xf32>
    %cst_53 = arith.constant 0.000000e+00 : f32
    %155 = vector.broadcast %cst_53 : f32 to vector<8x8xf32>
    %156 = arith.subf %155, %152 : vector<8x8xf32>
    %157 = arith.select %154, %152, %156 : vector<8x8xi1>, vector<8x8xf32>
    %cst_54 = arith.constant 1.000000e+00 : f32
    %158 = vector.broadcast %cst_54 : f32 to vector<8x8xf32>
    %159 = arith.addf %158, %157 : vector<8x8xf32>
    %160 = arith.mulf %122, %159 : vector<8x8xf32>
    %c0_55 = arith.constant 0 : index
    %c0_56 = arith.constant 0 : index
    %161 = vector.load %arg6[%c0_55, %c0_56] : memref<8x4xf32, #tpu.memory_space<vmem>>, vector<8x4xf32>
    %cst_57 = arith.constant dense<0.000000e+00> : vector<8x4xf32>
    %162 = tpu.matmul %160, %161, %cst_57 {dimension_numbers = #tpu.dot_dimension_numbers<[1], [0], [0], [1], [0, 0, 1, 1], [], []>} : vector<8x8xf32>, vector<8x4xf32>, vector<8x4xf32> -> vector<8x4xf32>
    %163 = vector.broadcast %7 : vector<1x4xf32> to vector<8x4xf32>
    %164 = arith.addf %162, %163 : vector<8x4xf32>
    %cst_58 = arith.constant 5.000000e-01 : f32
    %165 = vector.broadcast %cst_58 : f32 to vector<8x4xf32>
    %166 = arith.mulf %165, %164 : vector<8x4xf32>
    %cst_59 = arith.constant 0.707106769 : f32
    %167 = vector.broadcast %cst_59 : f32 to vector<8x4xf32>
    %168 = arith.mulf %164, %167 : vector<8x4xf32>
    %169 = math.absf %168 : vector<8x4xf32>
    %cst_60 = arith.constant 0.327591091 : f32
    %170 = vector.broadcast %cst_60 : f32 to vector<8x4xf32>
    %171 = arith.mulf %170, %169 : vector<8x4xf32>
    %cst_61 = arith.constant 1.000000e+00 : f32
    %172 = vector.broadcast %cst_61 : f32 to vector<8x4xf32>
    %173 = arith.addf %172, %171 : vector<8x4xf32>
    %cst_62 = arith.constant 1.000000e+00 : f32
    %174 = vector.broadcast %cst_62 : f32 to vector<8x4xf32>
    %175 = arith.divf %174, %173 : vector<8x4xf32>
    %cst_63 = arith.constant 1.06140542 : f32
    %176 = vector.broadcast %cst_63 : f32 to vector<8x4xf32>
    %177 = arith.mulf %176, %175 : vector<8x4xf32>
    %cst_64 = arith.constant -1.45315206 : f32
    %178 = vector.broadcast %cst_64 : f32 to vector<8x4xf32>
    %179 = arith.addf %177, %178 : vector<8x4xf32>
    %180 = arith.mulf %179, %175 : vector<8x4xf32>
    %cst_65 = arith.constant 1.42141378 : f32
    %181 = vector.broadcast %cst_65 : f32 to vector<8x4xf32>
    %182 = arith.addf %180, %181 : vector<8x4xf32>
    %183 = arith.mulf %182, %175 : vector<8x4xf32>
    %cst_66 = arith.constant -0.284496725 : f32
    %184 = vector.broadcast %cst_66 : f32 to vector<8x4xf32>
    %185 = arith.addf %183, %184 : vector<8x4xf32>
    %186 = arith.mulf %185, %175 : vector<8x4xf32>
    %cst_67 = arith.constant 0.254829586 : f32
    %187 = vector.broadcast %cst_67 : f32 to vector<8x4xf32>
    %188 = arith.addf %186, %187 : vector<8x4xf32>
    %189 = arith.mulf %188, %175 : vector<8x4xf32>
    %cst_68 = arith.constant 0.000000e+00 : f32
    %190 = vector.broadcast %cst_68 : f32 to vector<8x4xf32>
    %191 = arith.subf %190, %169 : vector<8x4xf32>
    %192 = arith.mulf %191, %169 : vector<8x4xf32>
    %193 = math.exp %192 : vector<8x4xf32>
    %194 = arith.mulf %189, %193 : vector<8x4xf32>
    %cst_69 = arith.constant 1.000000e+00 : f32
    %195 = vector.broadcast %cst_69 : f32 to vector<8x4xf32>
    %196 = arith.subf %195, %194 : vector<8x4xf32>
    %cst_70 = arith.constant 0.000000e+00 : f32
    %197 = vector.broadcast %cst_70 : f32 to vector<8x4xf32>
    %198 = arith.cmpf oge, %168, %197 : vector<8x4xf32>
    %cst_71 = arith.constant 0.000000e+00 : f32
    %199 = vector.broadcast %cst_71 : f32 to vector<8x4xf32>
    %200 = arith.subf %199, %196 : vector<8x4xf32>
    %201 = arith.select %198, %196, %200 : vector<8x4xi1>, vector<8x4xf32>
    %cst_72 = arith.constant 1.000000e+00 : f32
    %202 = vector.broadcast %cst_72 : f32 to vector<8x4xf32>
    %203 = arith.addf %202, %201 : vector<8x4xf32>
    %204 = arith.mulf %166, %203 : vector<8x4xf32>
    %c0_73 = arith.constant 0 : index
    %c0_74 = arith.constant 0 : index
    %205 = vector.load %arg7[%c0_73, %c0_74] : memref<4x1xf32, #tpu.memory_space<vmem>>, vector<4x1xf32>
    %cst_75 = arith.constant dense<0.000000e+00> : vector<8x1xf32>
    %206 = tpu.matmul %204, %205, %cst_75 {dimension_numbers = #tpu.dot_dimension_numbers<[1], [0], [0], [1], [0, 0, 1, 1], [], []>} : vector<8x4xf32>, vector<4x1xf32>, vector<8x1xf32> -> vector<8x1xf32>
    %207 = vector.broadcast %8 : vector<1x1xf32> to vector<8x1xf32>
    %208 = arith.addf %206, %207 : vector<8x1xf32>
    %209 = tpu.iota {dimensions = array<i32: 0>} : vector<8x8xi32>
    %210 = tpu.iota {dimensions = array<i32: 1>} : vector<8x8xi32>
    %211 = arith.cmpi eq, %209, %210 : vector<8x8xi32>
    %cst_76 = arith.constant 0.000000e+00 : f32
    %212 = vector.shape_cast %208 : vector<8x1xf32> to vector<8x1xf32>
    %213 = vector.broadcast %212 : vector<8x1xf32> to vector<8x8xf32>
    %214 = vector.broadcast %cst_76 : f32 to vector<8x8xf32>
    %215 = arith.select %211, %213, %214 : vector<8x8xi1>, vector<8x8xf32>
    %cst_77 = arith.constant dense<0.000000e+00> : vector<8xf32>
    %216 = vector.multi_reduction <add>, %215, %cst_77 [0] : vector<8x8xf32> to vector<8xf32>
    %217 = vector.shape_cast %216 : vector<8xf32> to vector<1x8xf32>
    %cst_78 = arith.constant dense<0x7F800000> : vector<1xf32>
    %218 = vector.multi_reduction <minimumf>, %217, %cst_78 [1] : vector<1x8xf32> to vector<1xf32>
    %219 = vector.shape_cast %218 : vector<1xf32> to vector<1x1xf32>
    %cst_79 = arith.constant dense<0xFF800000> : vector<1xf32>
    %220 = vector.multi_reduction <maximumf>, %217, %cst_79 [1] : vector<1x8xf32> to vector<1xf32>
    %221 = vector.shape_cast %220 : vector<1xf32> to vector<1x1xf32>
    %222 = vector.broadcast %219 : vector<1x1xf32> to vector<1x8xf32>
    %223 = arith.subf %217, %222 : vector<1x8xf32>
    %224 = arith.subf %221, %219 : vector<1x1xf32>
    %cst_80 = arith.constant 9.99999974E-6 : f32
    %225 = vector.broadcast %cst_80 : f32 to vector<1x1xf32>
    %226 = arith.addf %224, %225 : vector<1x1xf32>
    %227 = vector.broadcast %226 : vector<1x1xf32> to vector<1x8xf32>
    %228 = arith.divf %223, %227 : vector<1x8xf32>
    %c0_81 = arith.constant 0 : index
    %c0_82 = arith.constant 0 : index
    %c0_83 = arith.constant 0 : index
    %229 = vector.load %arg8[%c0_81, %c0_82, %c0_83] : memref<1x1x8xf32, #tpu.memory_space<vmem>>, vector<1x1x8xf32>
    %230 = vector.shape_cast %229 : vector<1x1x8xf32> to vector<1x8xf32>
    %231 = vector.shape_cast %228 : vector<1x8xf32> to vector<1x1x8xf32>
    tpu.vector_store %arg8[%c0_81, %c0_82, %c0_83], %231 {strides = array<i32>} : memref<1x1x8xf32, #tpu.memory_space<vmem>>, vector<1x1x8xf32>,
    return
  }
  func.func @transform_0(%arg0: i32) -> (i32, i32, i32) {
    %c0_i32 = arith.constant 0 : i32
    %c0_i32_0 = arith.constant 0 : i32
    %c0_i32_1 = arith.constant 0 : i32
    return %arg0, %c0_i32, %c0_i32_0 : i32, i32, i32
  }
  func.func @transform_1(%arg0: i32) -> (i32, i32) {
    %c0_i32 = arith.constant 0 : i32
    %c0_i32_0 = arith.constant 0 : i32
    %c0_i32_1 = arith.constant 0 : i32
    return %c0_i32, %c0_i32_0 : i32, i32
  }
  func.func @transform_2(%arg0: i32) -> (i32, i32) {
    %c0_i32 = arith.constant 0 : i32
    %c0_i32_0 = arith.constant 0 : i32
    %c0_i32_1 = arith.constant 0 : i32
    return %c0_i32, %c0_i32_0 : i32, i32
  }
  func.func @transform_3(%arg0: i32) -> (i32, i32) {
    %c0_i32 = arith.constant 0 : i32
    %c0_i32_0 = arith.constant 0 : i32
    %c0_i32_1 = arith.constant 0 : i32
    return %c0_i32, %c0_i32_0 : i32, i32
  }
  func.func @transform_4(%arg0: i32) -> (i32, i32) {
    %c0_i32 = arith.constant 0 : i32
    %c0_i32_0 = arith.constant 0 : i32
    %c0_i32_1 = arith.constant 0 : i32
    return %c0_i32, %c0_i32_0 : i32, i32
  }
  func.func @transform_5(%arg0: i32) -> (i32, i32) {
    %c0_i32 = arith.constant 0 : i32
    %c0_i32_0 = arith.constant 0 : i32
    %c0_i32_1 = arith.constant 0 : i32
    return %c0_i32, %c0_i32_0 : i32, i32
  }
  func.func @transform_6(%arg0: i32) -> (i32, i32) {
    %c0_i32 = arith.constant 0 : i32
    %c0_i32_0 = arith.constant 0 : i32
    %c0_i32_1 = arith.constant 0 : i32
    return %c0_i32, %c0_i32_0 : i32, i32
  }
  func.func @transform_7(%arg0: i32) -> (i32, i32, i32) {
    %c0_i32 = arith.constant 0 : i32
    %c0_i32_0 = arith.constant 0 : i32
    %c0_i32_1 = arith.constant 0 : i32
    return %arg0, %c0_i32, %c0_i32_0 : i32, i32, i32
  }
}

</mosaic_0001>

<bundles_post_ra>
// kernel: tpu_custom_call.1
= control target key start
LH: loop header
LB: loop body
LE: loop exit
PB: predicated region body
PF: predicated region fallthrough
CT: control target
= control target key end

     0   :  { %12 = vsyncpa [#allocation3], 0  ;;  %s6481_s0 = inlined_call_operand.vmem [shape: f32[2,392,72], index: 0, kind: input, shape index: {}]   ;;  %s6482_s1 = inlined_call_operand.vmem [shape: f32[72,8], index: 1, kind: input, shape index: {}]   ;;  %s6483_s2 = inlined_call_operand.vmem [shape: f32[8,16], index: 2, kind: input, shape index: {}]   ;;  %s6484_s3 = inlined_call_operand.vmem [shape: f32[16,16], index: 3, kind: input, shape index: {}]   ;;  %s6485_s4 = inlined_call_operand.vmem [shape: f32[16,8], index: 4, kind: input, shape index: {}]   ;;  %s6486_s5 = inlined_call_operand.vmem [shape: f32[8,4], index: 5, kind: input, shape index: {}]   ;;  %s6487_s6 = inlined_call_operand.vmem [shape: f32[4,1], index: 6, kind: input, shape index: {}]   ;;  %s6488_s7 = inlined_call_operand.hbm [shape: f32[2,1,8], index: 7, kind: output, shape index: {}]  }
   0x1   :  { %14 = vsyncpa [#allocation3 + $0x1], 0  ;;  %s5662_s24 = smov 0   ;;  %s5664_s25 = smov 0  }
   0x2   :  { %s5666_s26 = smov 0   ;;  %s5668_s27 = smov 0  }
   0x3 LB: > { %s5683_s28 = sadd.s32 4294967295, %s5614_s27   ;;  %s5141_s29 = sadd.s32 4294967294, %s5614_s27   ;;  %s5614_s27 = sphi %s5668_s27, %s6494_s27   ;;  %s5610_s26 = sphi %s5666_s26, %s6493_s26   ;;  %s5606_s25 = sphi %s5664_s25, %s6492_s25   ;;  %s5602_s24 = sphi %s5662_s24, %s6491_s24  }
   0x4   : > { %s5687_s30 = sadd.s32 1, %s5614_s27   ;;  %s179_s8 = sadd.s32 1, %s5610_s26 }
   0x5   : > { %s176_s9 = ssub.s32 %s5614_s27, %s5687_s30  ;;  %p189_p0 = scmp.ne.s32.totalorder %s5610_s26, %s5606_s25 }
   0x6   : > { %p177_p1 = scmp.eq.s32.totalorder %s176_s9, 0  ;;  %p190_p2 = scmp.eq.s32.totalorder %s5683_s28, 1 }
   0x7   : > { %p195_p3 = scmp.ne.s32.totalorder %s5606_s25, %s5602_s24  ;;  %p196_p4 = scmp.eq.s32.totalorder %s5141_s29, 1 }
   0x8   : > { %s5698_s10 = scalar_select %p177_p1, %s5610_s26, %s179_s8  }
   0x9   : > { %p5700_p5 = por %p190_p2, %p189_p0  ;;  %p5704_p6 = por %p196_p4, %p195_p3 }
   0xa   : > { %p5144_p7 = scmp.ge.s32.totalorder %s5614_s27, 1  ;;  %p240_p8 = scmp.lt.s32.totalorder %s5614_s27, 3 }
   0xc   : > { %p241_p9 = pnand %p5144_p7, %p240_p8 }
   0xd   : > { %v326_v0 = vld [vmem:[%s6482_s1] sm:$0xff] (!%p241_p9)  ;;  %v327_v1 = vld [vmem:[%s6482_s1 + $0x8] sm:$0xff] (!%p241_p9)  ;;  %v328_v2 = vld [vmem:[%s6482_s1 + $0x10] sm:$0xff] (!%p241_p9)  ;;  %v5616_v3 = vmov (!%p241_p9), 0.0|0.0   ;;  %vm5617_vm0 = vmmov (!%p241_p9), 0   ;;  %v5618_v6 = vmov (!%p241_p9), 0.0  }
   0xe   : > { %244 = sbr.rel (%p241_p9) target bundleno = 2142 (0x85e), region = 48  ;;  %5460 = vmatprep.subr.bf16.mxu0 (!%p241_p9), %v5616_v3  ;;  %v5461_v4 = vpack.c.bf16 (!%p241_p9), %v327_v1, %v326_v0  ;;  %v329_v5 = vld [vmem:[%s6482_s1 + $0x18] sm:$0xff] (!%p241_p9)  ;;  %5478 = vmatprep.subr.bf16.mxu1 (!%p241_p9), %v5616_v3  ;;  %p271_p10 = scmp.lt.s32.totalorder (!%p241_p9), %s5683_s28, 1  ;;  %v330_v8 = vld [vmem:[%s6482_s1 + $0x20] sm:$0xff] (!%p241_p9)  ;;  %v331_v9 = vld [vmem:[%s6482_s1 + $0x28] sm:$0xff] (!%p241_p9)  ;;  %vm335_vm1 = vcmask (!%p241_p9), 588800   ;;  %v793_v0 = vlaneseq (!%p241_p9) }
   0xf   : > { %5289 = vmatprep.mubr.msk.f32.mxu0 (!%p241_p9), %vm5617_vm0, %v5618_v6  ;;  %5370 = vmatprep.mubr.msk.f32.mxu1 (!%p241_p9), %vm5617_vm0, %v5618_v6  ;;  %v5464_v7 = vpack.c.bf16 (!%p241_p9), %v329_v5, %v328_v2  ;;  %v5467_v10 = vpack.c.bf16 (!%p241_p9), %v331_v9, %v330_v8  ;;  %v332_v11 = vld [vmem:[%s6482_s1 + $0x30] sm:$0xff] (!%p241_p9)  ;;  %v333_v12 = vld [vmem:[%s6482_s1 + $0x38] sm:$0xff] (!%p241_p9)  ;;  %v334_v14 = vld [vmem:[%s6482_s1 + $0x40] sm:$0xff] (!%p241_p9)  ;;  %vm2517_vm2 = vcmask (!%p241_p9), 64512   ;;  %vm4574_vm15 = vcmask (!%p241_p9), 1041409   ;;  %s5619_s29 = smov (!%p241_p9), 8  }
  0x10   : > { %5462 = vmatpush3.bf16.msra.mxu0 (!%p241_p9), %v5461_v4  ;;  %5483 = vmatpush3.bf16.msra.mxu1 (!%p241_p9), %v5461_v4  ;;  %v5470_v13 = vpack.c.bf16 (!%p241_p9), %v333_v12, %v332_v11  ;;  %v5954_v1 = vshrl.u32 (!%p241_p9), %v793_v0, 7  ;;  %v276_v4 = vld [vmem:[%s6483_s2] sm:$0xff] (!%p241_p9)  ;;  %s5200_s9 = sshll.u32 (!%p241_p9), %s5683_s28, 4 }
  0x11   : > { %5463 = vmatprep.subr.bf16.mxu0 (!%p241_p9), %v5616_v3  ;;  %5479 = vmatprep.subr.bf16.mxu1 (!%p241_p9), %v5616_v3  ;;  %s6439_s17 = scalar_lea.hbm (!%p241_p9), %s6488_s7, %s5200_s9 }
  0x12   : > { %v795_v2 = vsub.s32 (!%p241_p9), 0, %v5954_v1  ;;  %v848_v5 = vsub.s32 (!%p241_p9), 1, %v5954_v1 }
  0x14   : > { %5465 = vmatpush3.bf16.msra.mxu0 (!%p241_p9), %v5464_v7  ;;  %5484 = vmatpush3.bf16.msra.mxu1 (!%p241_p9), %v5464_v7  ;;  %v5961_v7 = vrot.slane (!%p241_p9), %v276_v4, %v795_v2  ;;  %v5963_v9 = vrot.slane (!%p241_p9), %v276_v4, %v848_v5 }
  0x15   : > { %s272_s8 = scalar_select %p271_p10, %s5683_s28, 1  ;;  %5466 = vmatprep.subr.bf16.mxu0 %v5616_v3  ;;  %5480 = vmatprep.subr.bf16.mxu1 %v5616_v3 }
  0x16   : > { %s5621_s28 = smov [#allocation2]  }
  0x17   : > { %s5488_s16 = smul.u32 392, %s272_s8  ;;  %s269_s8 = sand.u32 1, %s5606_s25  }
  0x18   : > { %5468 = vmatpush3.bf16.msra.mxu0 %v5467_v10  ;;  %5485 = vmatpush3.bf16.msra.mxu1 %v5467_v10  ;;  %s270_s13 = scalar_lea.vmem [#allocation2], %s269_s8  ;;  %s5074_s18 = scalar_lea.sflag [#allocation3], %s269_s8 }
  0x19   : > { %5469 = vmatprep.subr.bf16.mxu0 %v5616_v3  ;;  %5481 = vmatprep.subr.bf16.mxu1 %v5616_v3  ;;  %s5751_s19 = scalar_lea.vmem %s6481_s0, %s5488_s16  ;;  %s5086_s14 = sshll.u32 %s270_s13, 4  ;;  %s6441_s14 = int_to_ptr.vmem [resolvable:$true] %s5086_s14 }
  0x1a   : > { %v277_v15 = vld [vmem:[%s5751_s19] sm:$0xff]  ;;  %v304_v16 = vld [vmem:[%s5751_s19 + $0xd8] sm:$0xff]  ;;  %v278_v17 = vld [vmem:[%s5751_s19 + $0x8] sm:$0xff]  ;;  %s5556_s20 = sshll.u32 %s5621_s28, 4  ;;  %s5557_s20 = int_to_ptr.vmem [resolvable:$false] %s5556_s20 }
  0x1b   : > { %v305_v18 = vld [vmem:[%s5751_s19 + $0xe0] sm:$0xff]  ;;  %v279_v19 = vld [vmem:[%s5751_s19 + $0x10] sm:$0xff]  ;;  %v306_v20 = vld [vmem:[%s5751_s19 + $0xe8] sm:$0xff]  ;;  %s5558_s21 = scalar_lea.vmem %s5557_s20, 32  ;;  %p5559_p0 = scmp.lt.s32.totalorder %s6441_s14, %s5557_s20 }
  0x1c   : > { %5471 = vmatpush3.bf16.msra.mxu0 %v5470_v13  ;;  %5486 = vmatpush3.bf16.msra.mxu1 %v5470_v13  ;;  %v280_v21 = vld [vmem:[%s5751_s19 + $0x18] sm:$0xff]  ;;  %v307_v22 = vld [vmem:[%s5751_s19 + $0xf0] sm:$0xff]  ;;  %v281_v23 = vld [vmem:[%s5751_s19 + $0x20] sm:$0xff] }
  0x1d   : > { %5287 = vmatprep.subr.mxu0 %v5618_v6  ;;  %5482 = vmatprep.subr.mxu1 %v5618_v6  ;;  %v308_v24 = vld [vmem:[%s5751_s19 + $0xf8] sm:$0xff]  ;;  %v282_v25 = vld [vmem:[%s5751_s19 + $0x28] sm:$0xff]  ;;  %v309_v26 = vld [vmem:[%s5751_s19 + $0x100] sm:$0xff] }
  0x1e   : > { %v283_v27 = vld [vmem:[%s5751_s19 + $0x30] sm:$0xff]  ;;  %v310_v28 = vld [vmem:[%s5751_s19 + $0x108] sm:$0xff]  ;;  %v284_v29 = vld [vmem:[%s5751_s19 + $0x38] sm:$0xff] }
  0x1f   : > { %v311_v30 = vld [vmem:[%s5751_s19 + $0x110] sm:$0xff]  ;;  %v285_v31 = vld [vmem:[%s5751_s19 + $0x40] sm:$0xff]  ;;  %v312_v32 = vld [vmem:[%s5751_s19 + $0x118] sm:$0xff] }
  0x20   : > { %5288 = vmatpush3.msra.mxu0 %v334_v14  ;;  %5487 = vmatpush3.msra.mxu1 %v334_v14  ;;  %v286_v33 = vld [vmem:[%s5751_s19 + $0x48] sm:$0xff]  ;;  %v313_v34 = vld [vmem:[%s5751_s19 + $0x120] sm:$0xff]  ;;  %v287_v35 = vld [vmem:[%s5751_s19 + $0x50] sm:$0xff] }
  0x21   : > { %5290 = vmatmul.mubr.msk.f32.vlgmr.msra.gmra.mrb[0].mxu0 %vm335_vm1, %v277_v15  ;;  %5371 = vmatmul.mubr.msk.f32.vlgmr.msra.gmra.mrb[0].mxu1 %vm335_vm1, %v304_v16  ;;  %v314_v36 = vld [vmem:[%s5751_s19 + $0x128] sm:$0xff]  ;;  %v288_v37 = vld [vmem:[%s5751_s19 + $0x58] sm:$0xff]  ;;  %v315_v38 = vld [vmem:[%s5751_s19 + $0x130] sm:$0xff] }
  0x22   : > { %5292 = vmatprep.mubr.msk.f32.mxu0 %vm5617_vm0, %v5618_v6  ;;  %5373 = vmatprep.mubr.msk.f32.mxu1 %vm5617_vm0, %v5618_v6  ;;  %v289_v39 = vld [vmem:[%s5751_s19 + $0x60] sm:$0xff]  ;;  %v316_v40 = vld [vmem:[%s5751_s19 + $0x138] sm:$0xff]  ;;  %v290_v41 = vld [vmem:[%s5751_s19 + $0x68] sm:$0xff] }
  0x23   : > { %5472 = vmatprep.subr.bf16.mxu1 %v5616_v3  ;;  %v317_v42 = vld [vmem:[%s5751_s19 + $0x140] sm:$0xff]  ;;  %v291_v43 = vld [vmem:[%s5751_s19 + $0x70] sm:$0xff]  ;;  %v318_v44 = vld [vmem:[%s5751_s19 + $0x148] sm:$0xff] }
  0x24   : > { %v292_v45 = vld [vmem:[%s5751_s19 + $0x78] sm:$0xff]  ;;  %v319_v46 = vld [vmem:[%s5751_s19 + $0x150] sm:$0xff]  ;;  %v293_v47 = vld [vmem:[%s5751_s19 + $0x80] sm:$0xff] }
  0x25   : > { %5293 = vmatmul.mubr.msk.f32.gmra.mrb[2].mxu0 %vm335_vm1, %v278_v17  ;;  %5374 = vmatmul.mubr.msk.f32.gmra.mrb[2].mxu1 %vm335_vm1, %v305_v18  ;;  %v320_v48 = vld [vmem:[%s5751_s19 + $0x158] sm:$0xff]  ;;  %v294_v49 = vld [vmem:[%s5751_s19 + $0x88] sm:$0xff]  ;;  %v321_v50 = vld [vmem:[%s5751_s19 + $0x160] sm:$0xff] }
  0x26   : > { %5295 = vmatprep.mubr.msk.f32.mxu0 %vm5617_vm0, %v5618_v6  ;;  %5376 = vmatprep.mubr.msk.f32.mxu1 %vm5617_vm0, %v5618_v6  ;;  %v295_v51 = vld [vmem:[%s5751_s19 + $0x90] sm:$0xff]  ;;  %v322_v52 = vld [vmem:[%s5751_s19 + $0x168] sm:$0xff]  ;;  %v296_v53 = vld [vmem:[%s5751_s19 + $0x98] sm:$0xff] }
  0x27   : > { %v323_v54 = vld [vmem:[%s5751_s19 + $0x170] sm:$0xff]  ;;  %v297_v55 = vld [vmem:[%s5751_s19 + $0xa0] sm:$0xff]  ;;  %v324_v56 = vld [vmem:[%s5751_s19 + $0x178] sm:$0xff] }
  0x28   : > { %v298_v57 = vld [vmem:[%s5751_s19 + $0xa8] sm:$0xff]  ;;  %v325_v58 = vld [vmem:[%s5751_s19 + $0x180] sm:$0xff]  ;;  %v299_v59 = vld [vmem:[%s5751_s19 + $0xb0] sm:$0xff] }
  0x29   : > { %5296 = vmatmul.mubr.msk.f32.gmra.mrb[4].mxu0 %vm335_vm1, %v279_v19  ;;  %5377 = vmatmul.mubr.msk.f32.gmra.mrb[4].mxu1 %vm335_vm1, %v306_v20  ;;  %v300_v60 = vld [vmem:[%s5751_s19 + $0xb8] sm:$0xff]  ;;  %v301_v61 = vld [vmem:[%s5751_s19 + $0xc0] sm:$0xff]  ;;  %v302_v62 = vld [vmem:[%s5751_s19 + $0xc8] sm:$0xff] }
  0x2a   : > { %5298 = vmatprep.mubr.msk.f32.mxu0 %vm5617_vm0, %v5618_v6  ;;  %5379 = vmatprep.mubr.msk.f32.mxu1 %vm5617_vm0, %v5618_v6  ;;  %v303_v63 = vld [vmem:[%s5751_s19 + $0xd0] sm:$0xff]  ;;  %s5552_s19 = scalar_lea.vmem %s6441_s14, 16 }
  0x2b   : > { %p5553_p11 = scmp.ne.s32.totalorder %s6441_s14, %s5552_s19  ;;  %p5560_p1 = scmp.lt.s32.totalorder %s5558_s21, %s5552_s19 }
  0x2d   : > { %5299 = vmatmul.mubr.msk.f32.gmra.mrb[6].mxu0 %vm335_vm1, %v280_v21  ;;  %5380 = vmatmul.mubr.msk.f32.gmra.mrb[6].mxu1 %vm335_vm1, %v307_v22  ;;  %p5554_p12 = pnand %p5553_p11, %p5700_p5  ;;  %p5561_p2 = por %p5560_p1, %p5559_p0 }
  0x2e   : > { %5301 = vmatprep.mubr.msk.f32.mxu0 %vm5617_vm0, %v5618_v6  ;;  %5382 = vmatprep.mubr.msk.f32.mxu1 %vm5617_vm0, %v5618_v6 }
  0x2f   : > { %p5555_p13 = pneg %p5554_p12 }
  0x31   : > { %5302 = vmatmul.mubr.msk.f32.gmra.mrb[8].mxu0 %vm335_vm1, %v281_v23  ;;  %5383 = vmatmul.mubr.msk.f32.gmra.mrb[8].mxu1 %vm335_vm1, %v308_v24  ;;  %p5562_p3 = pnand %p5561_p2, %p5555_p13 }
  0x32   : > { %5304 = vmatprep.mubr.msk.f32.mxu0 %vm5617_vm0, %v5618_v6  ;;  %5385 = vmatprep.mubr.msk.f32.mxu1 %vm5617_vm0, %v5618_v6 }
  0x35   : > { %5305 = vmatmul.mubr.msk.f32.gmra.mrb[10].mxu0 %vm335_vm1, %v282_v25  ;;  %5386 = vmatmul.mubr.msk.f32.gmra.mrb[10].mxu1 %vm335_vm1, %v309_v26 }
  0x36   : > { %5307 = vmatprep.mubr.msk.f32.mxu0 %vm5617_vm0, %v5618_v6  ;;  %5388 = vmatprep.mubr.msk.f32.mxu1 %vm5617_vm0, %v5618_v6 }
  0x39   : > { %5308 = vmatmul.mubr.msk.f32.gmra.mrb[12].mxu0 %vm335_vm1, %v283_v27  ;;  %5389 = vmatmul.mubr.msk.f32.gmra.mrb[12].mxu1 %vm335_vm1, %v310_v28 }
  0x3a   : > { %5310 = vmatprep.mubr.msk.f32.mxu0 %vm5617_vm0, %v5618_v6  ;;  %5391 = vmatprep.mubr.msk.f32.mxu1 %vm5617_vm0, %v5618_v6 }
  0x3d   : > { %5311 = vmatmul.mubr.msk.f32.gmra.mrb[14].mxu0 %vm335_vm1, %v284_v29  ;;  %5392 = vmatmul.mubr.msk.f32.gmra.mrb[14].mxu1 %vm335_vm1, %v311_v30 }
  0x3e   : > { %5313 = vmatprep.mubr.msk.f32.mxu0 %vm5617_vm0, %v5618_v6  ;;  %5394 = vmatprep.mubr.msk.f32.mxu1 %vm5617_vm0, %v5618_v6 }
  0x41   : > { %5314 = vmatmul.mubr.msk.f32.gmra.mrb[16].mxu0 %vm335_vm1, %v285_v31  ;;  %5395 = vmatmul.mubr.msk.f32.gmra.mrb[16].mxu1 %vm335_vm1, %v312_v32 }
  0x42   : > { %5316 = vmatprep.mubr.msk.f32.mxu0 %vm5617_vm0, %v5618_v6  ;;  %5397 = vmatprep.mubr.msk.f32.mxu1 %vm5617_vm0, %v5618_v6 }
  0x45   : > { %5317 = vmatmul.mubr.msk.f32.gmra.mrb[18].mxu0 %vm335_vm1, %v286_v33  ;;  %5398 = vmatmul.mubr.msk.f32.gmra.mrb[18].mxu1 %vm335_vm1, %v313_v34 }
  0x46   : > { %5319 = vmatprep.mubr.msk.f32.mxu0 %vm5617_vm0, %v5618_v6  ;;  %5400 = vmatprep.mubr.msk.f32.mxu1 %vm5617_vm0, %v5618_v6 }
  0x49   : > { %5320 = vmatmul.mubr.msk.f32.gmra.mrb[20].mxu0 %vm335_vm1, %v287_v35  ;;  %5401 = vmatmul.mubr.msk.f32.gmra.mrb[20].mxu1 %vm335_vm1, %v314_v36  ;;  %v5982_v35 = vadd.s32 240, %v5954_v1 }
  0x4a   : > { %5322 = vmatprep.mubr.msk.f32.mxu0 %vm5617_vm0, %v5618_v6  ;;  %5403 = vmatprep.mubr.msk.f32.mxu1 %vm5617_vm0, %v5618_v6 }
  0x4b   : > { %vm1567_vm3 = vcmp.lt.s32.totalorder %v5982_v35, 245  ;;  %vm1224_vm4 = vcmp.ge.s32.totalorder %v5982_v35, 245 }
  0x4d   : > { %5323 = vmatmul.mubr.msk.f32.gmra.mrb[22].mxu0 %vm335_vm1, %v288_v37  ;;  %5404 = vmatmul.mubr.msk.f32.gmra.mrb[22].mxu1 %vm335_vm1, %v315_v38 }
  0x4e   : > { %5325 = vmatprep.mubr.msk.f32.mxu0 %vm5617_vm0, %v5618_v6  ;;  %5406 = vmatprep.mubr.msk.f32.mxu1 %vm5617_vm0, %v5618_v6 }
  0x51   : > { %5326 = vmatmul.mubr.msk.f32.gmra.mrb[24].mxu0 %vm335_vm1, %v289_v39  ;;  %5407 = vmatmul.mubr.msk.f32.gmra.mrb[24].mxu1 %vm335_vm1, %v316_v40 }
  0x52   : > { %5328 = vmatprep.mubr.msk.f32.mxu0 %vm5617_vm0, %v5618_v6  ;;  %5409 = vmatprep.mubr.msk.f32.mxu1 %vm5617_vm0, %v5618_v6 }
  0x55   : > { %5329 = vmatmul.mubr.msk.f32.gmra.mrb[26].mxu0 %vm335_vm1, %v290_v41  ;;  %5410 = vmatmul.mubr.msk.f32.gmra.mrb[26].mxu1 %vm335_vm1, %v317_v42 }
  0x56   : > { %5331 = vmatprep.mubr.msk.f32.mxu0 %vm5617_vm0, %v5618_v6  ;;  %5412 = vmatprep.mubr.msk.f32.mxu1 %vm5617_vm0, %v5618_v6 }
  0x59   : > { %5332 = vmatmul.mubr.msk.f32.gmra.mrb[28].mxu0 %vm335_vm1, %v291_v43  ;;  %5413 = vmatmul.mubr.msk.f32.gmra.mrb[28].mxu1 %vm335_vm1, %v318_v44 }
  0x5a   : > { %5334 = vmatprep.mubr.msk.f32.mxu0 %vm5617_vm0, %v5618_v6  ;;  %5415 = vmatprep.mubr.msk.f32.mxu1 %vm5617_vm0, %v5618_v6 }
  0x5d   : > { %5335 = vmatmul.mubr.msk.f32.gmra.mrb[30].mxu0 %vm335_vm1, %v292_v45  ;;  %5416 = vmatmul.mubr.msk.f32.gmra.mrb[30].mxu1 %vm335_vm1, %v319_v46 }
  0x5e   : > { %5337 = vmatprep.mubr.msk.f32.mxu0 %vm5617_vm0, %v5618_v6  ;;  %5418 = vmatprep.mubr.msk.f32.mxu1 %vm5617_vm0, %v5618_v6 }
  0x61   : > { %5338 = vmatmul.mubr.msk.f32.gmra.mrb[32].mxu0 %vm335_vm1, %v293_v47  ;;  %5419 = vmatmul.mubr.msk.f32.gmra.mrb[32].mxu1 %vm335_vm1, %v320_v48 }
  0x62   : > { %5340 = vmatprep.mubr.msk.f32.mxu0 %vm5617_vm0, %v5618_v6  ;;  %5421 = vmatprep.mubr.msk.f32.mxu1 %vm5617_vm0, %v5618_v6 }
  0x65   : > { %5341 = vmatmul.mubr.msk.f32.gmra.mrb[34].mxu0 %vm335_vm1, %v294_v49  ;;  %5422 = vmatmul.mubr.msk.f32.gmra.mrb[34].mxu1 %vm335_vm1, %v321_v50 }
  0x66   : > { %5343 = vmatprep.mubr.msk.f32.mxu0 %vm5617_vm0, %v5618_v6  ;;  %5424 = vmatprep.mubr.msk.f32.mxu1 %vm5617_vm0, %v5618_v6 }
  0x69   : > { %5344 = vmatmul.mubr.msk.f32.gmra.mrb[36].mxu0 %vm335_vm1, %v295_v51  ;;  %5425 = vmatmul.mubr.msk.f32.gmra.mrb[36].mxu1 %vm335_vm1, %v322_v52 }
  0x6a   : > { %5346 = vmatprep.mubr.msk.f32.mxu0 %vm5617_vm0, %v5618_v6  ;;  %5427 = vmatprep.mubr.msk.f32.mxu1 %vm5617_vm0, %v5618_v6 }
  0x6d   : > { %5347 = vmatmul.mubr.msk.f32.gmra.mrb[38].mxu0 %vm335_vm1, %v296_v53  ;;  %5428 = vmatmul.mubr.msk.f32.gmra.mrb[38].mxu1 %vm335_vm1, %v323_v54 }
  0x6e   : > { %5349 = vmatprep.mubr.msk.f32.mxu0 %vm5617_vm0, %v5618_v6  ;;  %5430 = vmatprep.mubr.msk.f32.mxu1 %vm5617_vm0, %v5618_v6 }
  0x71   : > { %5350 = vmatmul.mubr.msk.f32.gmra.mrb[40].mxu0 %vm335_vm1, %v297_v55  ;;  %5431 = vmatmul.mubr.msk.f32.gmra.mrb[40].mxu1 %vm335_vm1, %v324_v56 }
  0x72   : > { %5352 = vmatprep.mubr.msk.f32.mxu0 %vm5617_vm0, %v5618_v6  ;;  %5433 = vmatprep.mubr.msk.f32.mxu1 %vm5617_vm0, %v5618_v6 }
  0x75   : > { %5353 = vmatmul.mubr.msk.f32.gmra.mrb[42].mxu0 %vm335_vm1, %v298_v57  ;;  %5434 = vmatmul.mubr.msk.f32.gmra.mrb[42].mxu1 %vm335_vm1, %v325_v58 }
  0x76   : > { %5355 = vmatprep.mubr.msk.f32.mxu0 %vm5617_vm0, %v5618_v6  ;;  %5440 = vmatprep.mubr.msk.f32.mxu1 %vm5617_vm0, %v5618_v6 }
  0x79   : > { %5356 = vmatmul.mubr.msk.f32.gmra.mrb[44].mxu0 %vm335_vm1, %v299_v59 }
  0x7a   : > { %5358 = vmatprep.mubr.msk.f32.mxu0 %vm5617_vm0, %v5618_v6 }
  0x7d   : > { %5359 = vmatmul.mubr.msk.f32.gmra.mrb[46].mxu0 %vm335_vm1, %v300_v60  ;;  %v906_v60 = vadd.s32 48, %v5954_v1 }
  0x7e   : > { %5361 = vmatprep.mubr.msk.f32.mxu0 %vm5617_vm0, %v5618_v6 }
  0x7f   : > { %vm1347_vm5 = vcmp.lt.s32.totalorder %v906_v60, 49  ;;  %vm1004_vm6 = vcmp.ge.s32.totalorder %v906_v60, 49 }
  0x81   : > { %5362 = vmatmul.mubr.msk.f32.gmra.mrb[48].mxu0 %vm335_vm1, %v301_v61 }
  0x82   : > { %5364 = vmatprep.mubr.msk.f32.mxu0 %vm5617_vm0, %v5618_v6 }
  0x85   : > { %5365 = vmatmul.mubr.msk.f32.gmra.mrb[50].mxu0 %vm335_vm1, %v302_v62 }
  0x86   : > { %5367 = vmatprep.mubr.msk.f32.mxu0 %vm5617_vm0, %v5618_v6 }
  0x89   : > { %5368 = vmatmul.mubr.msk.f32.gmra.mrb[52].mxu0 %vm335_vm1, %v303_v63 }
  0xf4   : > { %v549_v8 = vpop.f32.mrb[0].mxu0  ;;  %v5965_v10 = vpop.f32.mrb[0].mxu1 }
  0xf5   : > { %v797_v11 = vmul.f32 %v5961_v7, %v549_v8  ;;  %v5291_v12 = vpop.f32.mrb[1].mxu0  ;;  %v5372_v13 = vpop.f32.mrb[1].mxu1 }
  0xf7   : > { %v850_v14 = vadd.f32 %v5963_v9, %v797_v11 }
  0xf8   : > { %v554_v15 = vpop.f32.mrb[2].mxu0  ;;  %v5969_v16 = vpop.f32.mrb[2].mxu1 }
  0xf9   : > { %v798_v17 = vmul.f32 %v5961_v7, %v554_v15  ;;  %v5294_v18 = vpop.f32.mrb[3].mxu0  ;;  %v5375_v19 = vpop.f32.mrb[3].mxu1  ;;  %v2518_v21 = vsel %vm2517_vm2, %v850_v14, 0.0  ;;  %v3742_v24 = vsel %vm2517_vm2, %v850_v14, -inf }
  0xfb   : > { %v851_v20 = vadd.f32 %v5963_v9, %v798_v17 }
  0xfc   : > { %v559_v22 = vpop.f32.mrb[4].mxu0  ;;  %v5974_v23 = vpop.f32.mrb[4].mxu1 }
  0xfd   : > { %v2519_v25 = vsel %vm2517_vm2, %v851_v20, 0.0  ;;  %v3743_v26 = vsel %vm2517_vm2, %v851_v20, -inf  ;;  %v799_v27 = vmul.f32 %v5961_v7, %v559_v22  ;;  %v5297_v28 = vpop.f32.mrb[5].mxu0  ;;  %v5378_v29 = vpop.f32.mrb[5].mxu1 }
  0xfe   : > { %v2520_v30 = vadd.f32 %v2519_v25, %v2518_v21  ;;  %v3744_v31 = vmax.f32 %v3742_v24, %v3743_v26 }
  0xff   : > { %v852_v32 = vadd.f32 %v5963_v9, %v799_v27 }
 0x100   : > { %v564_v33 = vpop.f32.mrb[6].mxu0  ;;  %v699_v34 = vpop.f32.mrb[6].mxu1 }
 0x101   : > { %v2521_v36 = vsel %vm2517_vm2, %v852_v32, 0.0  ;;  %v3745_v37 = vsel %vm2517_vm2, %v852_v32, -inf  ;;  %v800_v38 = vmul.f32 %v5961_v7, %v564_v33  ;;  %v5300_v39 = vpop.f32.mrb[7].mxu0  ;;  %v5381_v40 = vpop.f32.mrb[7].mxu1  ;;  %v827_v43 = vmul.f32 %v5961_v7, %v699_v34 }
 0x102   : > { %v2522_v41 = vadd.f32 %v2521_v36, %v2520_v30  ;;  %v3746_v42 = vmax.f32 %v3744_v31, %v3745_v37 }
 0x103   : > { %v853_v44 = vadd.f32 %v5963_v9, %v800_v38  ;;  %v5991_v46 = vadd.f32 %v5963_v9, %v827_v43 }
 0x104   : > { %v569_v45 = vpop.f32.mrb[8].mxu0  ;;  %v704_v47 = vpop.f32.mrb[8].mxu1 }
 0x105   : > { %v2523_v48 = vsel %vm2517_vm2, %v853_v44, 0.0  ;;  %v3747_v49 = vsel %vm2517_vm2, %v853_v44, -inf  ;;  %v801_v50 = vmul.f32 %v5961_v7, %v569_v45  ;;  %v5303_v51 = vpop.f32.mrb[9].mxu0  ;;  %v828_v52 = vmul.f32 %v5961_v7, %v704_v47  ;;  %v5384_v53 = vpop.f32.mrb[9].mxu1 }
 0x106   : > { %v2524_v54 = vadd.f32 %v2523_v48, %v2522_v41  ;;  %v3748_v55 = vmax.f32 %v3746_v42, %v3747_v49  ;;  %v6001_v56 = vsel %vm1567_vm3, %v5991_v46, 0.0  ;;  %v2400_v61 = vsel %vm1224_vm4, %v5991_v46, 0.0 }
 0x107   : > { %v854_v57 = vadd.f32 %v5963_v9, %v801_v50  ;;  %v881_v58 = vadd.f32 %v5963_v9, %v828_v52  ;;  %v3625_v62 = vsel %vm1224_vm4, %v5991_v46, -inf  ;;  %v3092_v11 = vsel %vm2517_vm2, %v2400_v61, 0.0 }
 0x108   : > { %v574_v59 = vpop.f32.mrb[10].mxu0  ;;  %v709_v63 = vpop.f32.mrb[10].mxu1  ;;  %v4316_v17 = vsel %vm2517_vm2, %v3625_v62, -inf }
 0x109   : > { %v2525_v2 = vsel %vm2517_vm2, %v854_v57, 0.0  ;;  %v3749_v4 = vsel %vm2517_vm2, %v854_v57, -inf  ;;  %v802_v5 = vmul.f32 %v5961_v7, %v574_v59  ;;  %v5306_v8 = vpop.f32.mrb[11].mxu0  ;;  %v5387_v12 = vpop.f32.mrb[11].mxu1  ;;  %v3094_v15 = vsel %vm2517_vm2, %v881_v58, 0.0 }
 0x10a   : > { %v2526_v13 = vadd.f32 %v2525_v2, %v2524_v54  ;;  %v3750_v14 = vmax.f32 %v3748_v55, %v3749_v4  ;;  %v3095_v19 = vadd.f32 %v3094_v15, %v3092_v11  ;;  %v4318_v20 = vsel %vm2517_vm2, %v881_v58, -inf }
 0x10b   : > { %v855_v18 = vadd.f32 %v5963_v9, %v802_v5  ;;  %v829_v21 = vmul.f32 %v5961_v7, %v709_v63  ;;  %v4319_v24 = vmax.f32 %v4316_v17, %v4318_v20 }
 0x10c   : > { %v579_v22 = vpop.f32.mrb[12].mxu0  ;;  %v714_v25 = vpop.f32.mrb[12].mxu1 }
 0x10d   : > { %v2527_v26 = vsel %vm2517_vm2, %v855_v18, 0.0  ;;  %v3751_v27 = vsel %vm2517_vm2, %v855_v18, -inf  ;;  %v803_v28 = vmul.f32 %v5961_v7, %v579_v22  ;;  %v5309_v29 = vpop.f32.mrb[13].mxu0  ;;  %v882_v30 = vadd.f32 %v5963_v9, %v829_v21  ;;  %v5390_v31 = vpop.f32.mrb[13].mxu1 }
 0x10e   : > { %v2528_v32 = vadd.f32 %v2527_v26, %v2526_v13  ;;  %v3752_v33 = vmax.f32 %v3750_v14, %v3751_v27  ;;  %v830_v34 = vmul.f32 %v5961_v7, %v714_v25 }
 0x10f   : > { %v856_v36 = vadd.f32 %v5963_v9, %v803_v28  ;;  %v3096_v37 = vsel %vm2517_vm2, %v882_v30, 0.0  ;;  %v4320_v38 = vsel %vm2517_vm2, %v882_v30, -inf  ;;  %v6055_v28 = vadd.s32 96, %v5954_v1 }
 0x110   : > { %v584_v39 = vpop.f32.mrb[14].mxu0  ;;  %v3097_v40 = vadd.f32 %v3096_v37, %v3095_v19  ;;  %v4321_v41 = vmax.f32 %v4319_v24, %v4320_v38  ;;  %v883_v42 = vadd.f32 %v5963_v9, %v830_v34  ;;  %v719_v43 = vpop.f32.mrb[14].mxu1  ;;  %v6048_v19 = vadd.s32 288, %v5954_v1 }
 0x111   : > { %v2131_v44 = vsel %vm1347_vm5, %v856_v36, 0.0  ;;  %v3356_v45 = vsel %vm1347_vm5, %v856_v36, -inf  ;;  %v804_v47 = vmul.f32 %v5961_v7, %v584_v39  ;;  %v2180_v48 = vsel %vm1004_vm6, %v856_v36, 0.0  ;;  %v5312_v49 = vpop.f32.mrb[15].mxu0  ;;  %v5393_v50 = vpop.f32.mrb[15].mxu1 }
 0x112   : > { %v2529_v51 = vsel %vm2517_vm2, %v2131_v44, 0.0  ;;  %v3753_v52 = vsel %vm2517_vm2, %v3356_v45, -inf  ;;  %v3405_v53 = vsel %vm1004_vm6, %v856_v36, -inf  ;;  %v3098_v59 = vsel %vm2517_vm2, %v883_v42, 0.0 }
 0x113   : > { %v6033_v54 = vadd.f32 %v2529_v51, %v2528_v32  ;;  %v6035_v55 = vmax.f32 %v3752_v33, %v3753_v52  ;;  %v857_v57 = vadd.f32 %v5963_v9, %v804_v47  ;;  %v4322_v61 = vsel %vm2517_vm2, %v883_v42, -inf }
 0x114   : > { %v589_v58 = vpop.f32.mrb[16].mxu0  ;;  %v831_v62 = vmul.f32 %v5961_v7, %v719_v43  ;;  %v724_v63 = vpop.f32.mrb[16].mxu1  ;;  %v2632_v2 = vsel %vm2517_vm2, %v2180_v48, 0.0  ;;  %v3856_v60 = vsel %vm2517_vm2, %v3405_v53, -inf  ;;  %v3099_v15 = vadd.f32 %v3098_v59, %v3097_v40 }
 0x115   : > { %v2634_v4 = vsel %vm2517_vm2, %v857_v57, 0.0  ;;  %v3858_v5 = vsel %vm2517_vm2, %v857_v57, -inf  ;;  %v5315_v8 = vpop.f32.mrb[17].mxu0  ;;  %v5396_v11 = vpop.f32.mrb[17].mxu1  ;;  %v805_v14 = vmul.f32 %v5961_v7, %v589_v58  ;;  %v4323_v17 = vmax.f32 %v4321_v41, %v4322_v61 }
 0x116   : > { %v2635_v12 = vadd.f32 %v2634_v4, %v2632_v2  ;;  %v3859_v13 = vmax.f32 %v3856_v60, %v3858_v5  ;;  %v884_v18 = vadd.f32 %v5963_v9, %v831_v62  ;;  %v832_v22 = vmul.f32 %v5961_v7, %v724_v63 }
 0x117   : > { %v858_v20 = vadd.f32 %v5963_v9, %v805_v14  ;;  %vm1622_vm7 = vcmp.lt.s32.totalorder %v6048_v19, 294  ;;  %v824_v43 = vmul.f32 %v5961_v7, %v5965_v10  ;;  %vm1279_vm8 = vcmp.ge.s32.totalorder %v6048_v19, 294 }
 0x118   : > { %v594_v21 = vpop.f32.mrb[18].mxu0  ;;  %v729_v24 = vpop.f32.mrb[18].mxu1  ;;  %v3100_v27 = vsel %vm2517_vm2, %v884_v18, 0.0  ;;  %v4324_v33 = vsel %vm2517_vm2, %v884_v18, -inf  ;;  %v885_v40 = vadd.f32 %v5963_v9, %v832_v22  ;;  %vm1402_vm9 = vcmp.lt.s32.totalorder %v6055_v28, 98 }
 0x119   : > { %v806_v25 = vmul.f32 %v5961_v7, %v594_v21  ;;  %v5318_v26 = vpop.f32.mrb[19].mxu0  ;;  %v5399_v29 = vpop.f32.mrb[19].mxu1  ;;  %v2636_v30 = vsel %vm2517_vm2, %v858_v20, 0.0  ;;  %v3860_v31 = vsel %vm2517_vm2, %v858_v20, -inf  ;;  %v3101_v32 = vadd.f32 %v3100_v27, %v3099_v15 }
 0x11a   : > { %v2637_v34 = vadd.f32 %v2636_v30, %v2635_v12  ;;  %v3861_v36 = vmax.f32 %v3859_v13, %v3860_v31  ;;  %v4325_v39 = vmax.f32 %v4323_v17, %v4324_v33  ;;  %v833_v41 = vmul.f32 %v5961_v7, %v729_v24 }
 0x11b   : > { %v859_v37 = vadd.f32 %v5963_v9, %v806_v25  ;;  %v3102_v51 = vsel %vm2517_vm2, %v885_v40, 0.0  ;;  %v4326_v52 = vsel %vm2517_vm2, %v885_v40, -inf  ;;  %vm1059_vm10 = vcmp.ge.s32.totalorder %v6055_v28, 98 }
 0x11c   : > { %v599_v38 = vpop.f32.mrb[20].mxu0  ;;  %v734_v42 = vpop.f32.mrb[20].mxu1  ;;  %v6077_v58 = vadd.s32 336, %v5954_v1  ;;  %v3103_v61 = vadd.f32 %v3102_v51, %v3101_v32  ;;  %v4327_v62 = vmax.f32 %v4325_v39, %v4326_v52  ;;  %v886_v63 = vadd.f32 %v5963_v9, %v833_v41 }
 0x11d   : > { %v807_v44 = vmul.f32 %v5961_v7, %v599_v38  ;;  %v5321_v45 = vpop.f32.mrb[21].mxu0  ;;  %v834_v47 = vmul.f32 %v5961_v7, %v734_v42  ;;  %v5402_v48 = vpop.f32.mrb[21].mxu1  ;;  %v2638_v49 = vsel %vm2517_vm2, %v859_v37, 0.0  ;;  %v3862_v50 = vsel %vm2517_vm2, %v859_v37, -inf }
 0x11e   : > { %v2639_v10 = vadd.f32 %v2638_v49, %v2637_v34  ;;  %v3863_v53 = vmax.f32 %v3861_v36, %v3862_v50  ;;  %v877_v60 = vadd.f32 %v5963_v9, %v824_v43  ;;  %v2406_v17 = vsel %vm1622_vm7, %v886_v63, 0.0 }
 0x11f   : > { %v860_v57 = vadd.f32 %v5963_v9, %v807_v44  ;;  %v887_v2 = vadd.f32 %v5963_v9, %v834_v47  ;;  %v3631_v18 = vsel %vm1622_vm7, %v886_v63, -inf  ;;  %v3104_v21 = vsel %vm2517_vm2, %v2406_v17, 0.0 }
 0x120   : > { %v604_v59 = vpop.f32.mrb[22].mxu0  ;;  %v739_v4 = vpop.f32.mrb[22].mxu1  ;;  %v4328_v22 = vsel %vm2517_vm2, %v3631_v18, -inf  ;;  %v2455_v24 = vsel %vm1279_vm8, %v886_v63, 0.0  ;;  %v6094_v25 = vadd.f32 %v3104_v21, %v3103_v61  ;;  %v6104_v41 = vadd.s32 144, %v5954_v1 }
 0x121   : > { %v2640_v5 = vsel %vm2517_vm2, %v860_v57, 0.0  ;;  %v3864_v8 = vsel %vm2517_vm2, %v860_v57, -inf  ;;  %v808_v11 = vmul.f32 %v5961_v7, %v604_v59  ;;  %v5324_v12 = vpop.f32.mrb[23].mxu0  ;;  %v5405_v13 = vpop.f32.mrb[23].mxu1  ;;  %v6096_v26 = vmax.f32 %v4327_v62, %v4328_v22 }
 0x122   : > { %v2641_v14 = vadd.f32 %v2640_v5, %v2639_v10  ;;  %v3865_v15 = vmax.f32 %v3863_v53, %v3864_v8  ;;  %v3207_v29 = vsel %vm2517_vm2, %v2455_v24, 0.0  ;;  %v3209_v30 = vsel %vm2517_vm2, %v887_v2, 0.0 }
 0x123   : > { %v861_v20 = vadd.f32 %v5963_v9, %v808_v11  ;;  %v3210_v37 = vadd.f32 %v3209_v30, %v3207_v29  ;;  %v6107_v42 = vadd.s32 192, %v5954_v1  ;;  %v6110_v43 = vsel %vm2517_vm2, %v877_v60, 0.0 }
 0x124   : > { %v609_v27 = vpop.f32.mrb[24].mxu0  ;;  %v744_v31 = vpop.f32.mrb[24].mxu1  ;;  %v6113_v44 = vsel %vm2517_vm2, %v877_v60, -inf  ;;  %v3680_v47 = vsel %vm1279_vm8, %v886_v63, -inf  ;;  %v4433_v50 = vsel %vm2517_vm2, %v887_v2, -inf  ;;  %v835_v51 = vmul.f32 %v5961_v7, %v739_v4 }
 0x125   : > { %v2642_v32 = vsel %vm2517_vm2, %v861_v20, 0.0  ;;  %v3866_v33 = vsel %vm2517_vm2, %v861_v20, -inf  ;;  %v809_v34 = vmul.f32 %v5961_v7, %v609_v27  ;;  %v5327_v36 = vpop.f32.mrb[25].mxu0  ;;  %v5408_v38 = vpop.f32.mrb[25].mxu1  ;;  %v4431_v49 = vsel %vm2517_vm2, %v3680_v47, -inf }
 0x126   : > { %v2643_v39 = vadd.f32 %v2642_v32, %v2641_v14  ;;  %v3867_v40 = vmax.f32 %v3865_v15, %v3866_v33  ;;  %v836_v52 = vmul.f32 %v5961_v7, %v744_v31  ;;  %v2615_v63 = vrot.slane %v6033_v54, 4 }
 0x127   : > { %v862_v45 = vadd.f32 %v5963_v9, %v809_v34  ;;  %v825_v2 = vmul.f32 %v5961_v7, %v5969_v16  ;;  %v3839_v13 = vrot.slane %v6035_v55, 4  ;;  %v4434_v15 = vmax.f32 %v4431_v49, %v4433_v50 }
 0x128   : > { %v614_v48 = vpop.f32.mrb[26].mxu0  ;;  %v749_v10 = vpop.f32.mrb[26].mxu1  ;;  %v888_v17 = vadd.f32 %v5963_v9, %v835_v51  ;;  %v889_v16 = vadd.f32 %v5963_v9, %v836_v52  ;;  %v826_v34 = vmul.f32 %v5961_v7, %v5974_v23  ;;  %vm1677_vm11 = vcmp.lt.s32.totalorder %v6077_v58, 343 }
 0x129   : > { %v2186_v53 = vsel %vm1402_vm9, %v862_v45, 0.0  ;;  %v3411_v57 = vsel %vm1402_vm9, %v862_v45, -inf  ;;  %v810_v59 = vmul.f32 %v5961_v7, %v614_v48  ;;  %v2235_v19 = vsel %vm1059_vm10, %v862_v45, 0.0  ;;  %v5330_v61 = vpop.f32.mrb[27].mxu0  ;;  %v5411_v62 = vpop.f32.mrb[27].mxu1 }
 0x12a   : > { %v2644_v4 = vsel %vm2517_vm2, %v2186_v53, 0.0  ;;  %v3868_v60 = vsel %vm2517_vm2, %v3411_v57, -inf  ;;  %v3460_v12 = vsel %vm1059_vm10, %v862_v45, -inf  ;;  %v2747_v20 = vsel %vm2517_vm2, %v2235_v19, 0.0 }
 0x12b   : > { %v6134_v5 = vadd.f32 %v2644_v4, %v2643_v39  ;;  %v6136_v8 = vmax.f32 %v3867_v40, %v3868_v60  ;;  %v863_v11 = vadd.f32 %v5963_v9, %v810_v59  ;;  %v3971_v22 = vsel %vm2517_vm2, %v3460_v12, -inf }
 0x12c   : > { %v619_v14 = vpop.f32.mrb[28].mxu0  ;;  %v754_v18 = vpop.f32.mrb[28].mxu1  ;;  %v3211_v32 = vsel %vm2517_vm2, %v888_v17, 0.0  ;;  %v6151_v33 = vadd.f32 %v5963_v9, %v825_v2  ;;  %v4435_v38 = vsel %vm2517_vm2, %v888_v17, -inf  ;;  %v3213_v47 = vsel %vm2517_vm2, %v889_v16, 0.0 }
 0x12d   : > { %v2749_v21 = vsel %vm2517_vm2, %v863_v11, 0.0  ;;  %v3973_v24 = vsel %vm2517_vm2, %v863_v11, -inf  ;;  %v5333_v27 = vpop.f32.mrb[29].mxu0  ;;  %v5414_v28 = vpop.f32.mrb[29].mxu1  ;;  %v811_v31 = vmul.f32 %v5961_v7, %v619_v14  ;;  %v3212_v36 = vadd.f32 %v3211_v32, %v3210_v37 }
 0x12e   : > { %v2750_v29 = vadd.f32 %v2749_v21, %v2747_v20  ;;  %v3974_v30 = vmax.f32 %v3971_v22, %v3973_v24  ;;  %v4436_v45 = vmax.f32 %v4434_v15, %v4435_v38  ;;  %v4437_v48 = vsel %vm2517_vm2, %v889_v16, -inf }
 0x12f   : > { %v864_v39 = vadd.f32 %v5963_v9, %v811_v31  ;;  %v6161_v50 = vadd.f32 %v2615_v63, %v6033_v54  ;;  %v6164_v51 = vmax.f32 %v6035_v55, %v3839_v13  ;;  %v3214_v52 = vadd.f32 %v3213_v47, %v3212_v36 }
 0x130   : > { %v624_v40 = vpop.f32.mrb[30].mxu0  ;;  %v759_v49 = vpop.f32.mrb[30].mxu1  ;;  %vm1334_vm12 = vcmp.ge.s32.totalorder %v6077_v58, 343  ;;  %v4438_v19 = vmax.f32 %v4436_v45, %v4437_v48  ;;  %v837_v61 = vmul.f32 %v5961_v7, %v749_v10  ;;  %v6173_v54 = vsel %vm2517_vm2, %v6151_v33, 0.0 }
 0x131   : > { %v812_v23 = vmul.f32 %v5961_v7, %v624_v40  ;;  %v5336_v37 = vpop.f32.mrb[31].mxu0  ;;  %v5417_v53 = vpop.f32.mrb[31].mxu1  ;;  %v2751_v57 = vsel %vm2517_vm2, %v864_v39, 0.0  ;;  %v3975_v59 = vsel %vm2517_vm2, %v864_v39, -inf  ;;  %v6176_v55 = vadd.f32 %v5963_v9, %v826_v34 }
 0x132   : > { %v2752_v62 = vadd.f32 %v2751_v57, %v2750_v29  ;;  %v3976_v63 = vmax.f32 %v3974_v30, %v3975_v59  ;;  %v890_v60 = vadd.f32 %v5963_v9, %v837_v61  ;;  %v838_v11 = vmul.f32 %v5961_v7, %v754_v18 }
 0x133   : > { %v865_v2 = vadd.f32 %v5963_v9, %v812_v23  ;;  %v839_v12 = vmul.f32 %v5961_v7, %v759_v49  ;;  %v2617_v10 = vrot.slane %v6161_v50, 2  ;;  %v3841_v14 = vrot.slane %v6164_v51, 2 }
 0x134   : > { %v629_v4 = vpop.f32.mrb[32].mxu0  ;;  %v764_v13 = vpop.f32.mrb[32].mxu1  ;;  %v3942_v15 = vrot.slane %v6136_v8, 4  ;;  %v3215_v24 = vsel %vm2517_vm2, %v890_v60, 0.0  ;;  %v4439_v18 = vsel %vm2517_vm2, %v890_v60, -inf  ;;  %vm1457_vm13 = vcmp.lt.s32.totalorder %v6104_v41, 147 }
 0x135   : > { %v813_v17 = vmul.f32 %v5961_v7, %v629_v4  ;;  %v5339_v16 = vpop.f32.mrb[33].mxu0  ;;  %v5420_v20 = vpop.f32.mrb[33].mxu1  ;;  %v2753_v21 = vsel %vm2517_vm2, %v865_v2, 0.0  ;;  %v3977_v22 = vsel %vm2517_vm2, %v865_v2, -inf  ;;  %vm1114_vm14 = vcmp.ge.s32.totalorder %v6104_v41, 147 }
 0x136   : > { %v2754_v27 = vadd.f32 %v2753_v21, %v2752_v62  ;;  %v3978_v28 = vmax.f32 %v3976_v63, %v3977_v22  ;;  %v840_v30 = vmul.f32 %v5961_v7, %v764_v13  ;;  %v3216_v31 = vadd.f32 %v3215_v24, %v3214_v52 }
 0x137   : > { %v866_v29 = vadd.f32 %v5963_v9, %v813_v17  ;;  %v4440_v32 = vmax.f32 %v4438_v19, %v4439_v18  ;;  %v891_v36 = vadd.f32 %v5963_v9, %v838_v11  ;;  %v892_v38 = vadd.f32 %v5963_v9, %v839_v12 }
 0x138   : > { %v634_v34 = vpop.f32.mrb[34].mxu0  ;;  %v769_v39 = vpop.f32.mrb[34].mxu1  ;;  %v6197_v40 = vmax.f32 %v6136_v8, %v3942_v15  ;;  %v893_v4 = vadd.f32 %v5963_v9, %v840_v30  ;;  %vm1512_vm1 = vcmp.lt.s32.totalorder %v6107_v42, 196  ;;  %vm1169_vm4 = vcmp.ge.s32.totalorder %v6107_v42, 196 }
 0x139   : > { %v2755_v45 = vsel %vm2517_vm2, %v866_v29, 0.0  ;;  %v3979_v47 = vsel %vm2517_vm2, %v866_v29, -inf  ;;  %v814_v48 = vmul.f32 %v5961_v7, %v634_v34  ;;  %v5342_v49 = vpop.f32.mrb[35].mxu0  ;;  %v5423_v23 = vpop.f32.mrb[35].mxu1  ;;  %v3217_v53 = vsel %vm2517_vm2, %v891_v36, 0.0 }
 0x13a   : > { %v2756_v37 = vadd.f32 %v2755_v45, %v2754_v27  ;;  %v3980_v52 = vmax.f32 %v3978_v28, %v3979_v47  ;;  %v4441_v57 = vsel %vm2517_vm2, %v891_v36, -inf  ;;  %v3218_v19 = vadd.f32 %v3217_v53, %v3216_v31 }
 0x13b   : > { %v867_v59 = vadd.f32 %v5963_v9, %v814_v48  ;;  %v4442_v61 = vmax.f32 %v4440_v32, %v4441_v57  ;;  %v2461_v8 = vsel %vm1677_vm11, %v892_v38, 0.0  ;;  %v3686_v63 = vsel %vm1677_vm11, %v892_v38, -inf }
 0x13c   : > { %v3219_v62 = vsel %vm2517_vm2, %v2461_v8, 0.0  ;;  %v639_v2 = vpop.f32.mrb[36].mxu0  ;;  %v2510_v60 = vsel %vm1334_vm12, %v892_v38, 0.0  ;;  %v774_v11 = vpop.f32.mrb[36].mxu1  ;;  %v4443_v17 = vsel %vm2517_vm2, %v3686_v63, -inf  ;;  %v6222_v27 = vmax.f32 %v6164_v51, %v3841_v14 }
 0x13d   : > { %v2757_v12 = vsel %vm2517_vm2, %v867_v59, 0.0  ;;  %v3981_v13 = vsel %vm2517_vm2, %v867_v59, -inf  ;;  %v6215_v15 = vadd.f32 %v3219_v62, %v3218_v19  ;;  %v5345_v16 = vpop.f32.mrb[37].mxu0  ;;  %v5426_v20 = vpop.f32.mrb[37].mxu1  ;;  %v6218_v24 = vmax.f32 %v4442_v61, %v4443_v17 }
 0x13e   : > { %v2758_v21 = vadd.f32 %v2757_v12, %v2756_v37  ;;  %v3982_v22 = vmax.f32 %v3980_v52, %v3981_v13  ;;  %v815_v18 = vmul.f32 %v5961_v7, %v639_v2  ;;  %v3322_v28 = vsel %vm2517_vm2, %v2510_v60, 0.0 }
 0x13f   : > { %v3324_v29 = vsel %vm2517_vm2, %v893_v4, 0.0  ;;  %v3735_v30 = vsel %vm1334_vm12, %v892_v38, -inf  ;;  %v4548_v45 = vsel %vm2517_vm2, %v893_v4, -inf  ;;  %v3944_v48 = vrot.slane %v6197_v40, 2 }
 0x140   : > { %v868_v31 = vadd.f32 %v5963_v9, %v815_v18  ;;  %v644_v32 = vpop.f32.mrb[38].mxu0  ;;  %v3325_v34 = vadd.f32 %v3324_v29, %v3322_v28  ;;  %v4546_v36 = vsel %vm2517_vm2, %v3735_v30, -inf  ;;  %v779_v47 = vpop.f32.mrb[38].mxu1  ;;  %v841_v23 = vmul.f32 %v5961_v7, %v769_v39 }
 0x141   : > { %v816_v51 = vmul.f32 %v5961_v7, %v644_v32  ;;  %v5348_v14 = vpop.f32.mrb[39].mxu0  ;;  %v4549_v49 = vmax.f32 %v4546_v36, %v4548_v45  ;;  %v5429_v37 = vpop.f32.mrb[39].mxu1  ;;  %v842_v17 = vmul.f32 %v5961_v7, %v774_v11  ;;  %v3843_v20 = vrot.slane %v6222_v27, 1 }
 0x142   : > { %v2241_v58 = vsel %vm1457_vm13, %v868_v31, 0.0  ;;  %v3466_v38 = vsel %vm1457_vm13, %v868_v31, -inf  ;;  %v2290_v52 = vsel %vm1114_vm14, %v868_v31, 0.0  ;;  %v3515_v53 = vsel %vm1114_vm14, %v868_v31, -inf }
 0x143   : > { %v2759_v57 = vsel %vm2517_vm2, %v2241_v58, 0.0  ;;  %v3983_v59 = vsel %vm2517_vm2, %v3466_v38, -inf  ;;  %v869_v19 = vadd.f32 %v5963_v9, %v816_v51  ;;  %v2862_v39 = vsel %vm2517_vm2, %v2290_v52, 0.0 }
 0x144   : > { %v2760_v61 = vadd.f32 %v2759_v57, %v2758_v21  ;;  %v3984_v8 = vmax.f32 %v3982_v22, %v3983_v59  ;;  %v4086_v62 = vsel %vm2517_vm2, %v3515_v53, -inf  ;;  %v649_v63 = vpop.f32.mrb[40].mxu0  ;;  %v894_v2 = vadd.f32 %v5963_v9, %v841_v23  ;;  %v784_v4 = vpop.f32.mrb[40].mxu1 }
 0x145   : > { %v2864_v60 = vsel %vm2517_vm2, %v869_v19, 0.0  ;;  %v4088_v41 = vsel %vm2517_vm2, %v869_v19, -inf  ;;  %v817_v12 = vmul.f32 %v5961_v7, %v649_v63  ;;  %v5351_v13 = vpop.f32.mrb[41].mxu0  ;;  %v5432_v16 = vpop.f32.mrb[41].mxu1  ;;  %v2718_v21 = vrot.slane %v6134_v5, 4 }
 0x146   : > { %v2865_v22 = vadd.f32 %v2864_v60, %v2862_v39  ;;  %v4089_v18 = vmax.f32 %v4086_v62, %v4088_v41  ;;  %v3326_v29 = vsel %vm2517_vm2, %v894_v2, 0.0  ;;  %v4550_v30 = vsel %vm2517_vm2, %v894_v2, -inf }
 0x147   : > { %v870_v28 = vadd.f32 %v5963_v9, %v817_v12  ;;  %v895_v31 = vadd.f32 %v5963_v9, %v842_v17  ;;  %v6259_v32 = vmax.f32 %v6197_v40, %v3944_v48  ;;  %v4045_v36 = vrot.slane %v3984_v8, 4 }
 0x148   : > { %v654_v11 = vpop.f32.mrb[42].mxu0  ;;  %v3327_v45 = vadd.f32 %v3326_v29, %v3325_v34  ;;  %v4551_v51 = vmax.f32 %v4549_v49, %v4550_v30  ;;  %v789_v14 = vpop.f32.mrb[42].mxu1  ;;  %v6266_v57 = vadd.f32 %v2718_v21, %v6134_v5  ;;  %v2821_v40 = vrot.slane %v2760_v61, 4 }
 0x149   : > { %v2866_v23 = vsel %vm2517_vm2, %v870_v28, 0.0  ;;  %v4090_v37 = vsel %vm2517_vm2, %v870_v28, -inf  ;;  %v818_v58 = vmul.f32 %v5961_v7, %v654_v11  ;;  %v5354_v38 = vpop.f32.mrb[43].mxu0  ;;  %v3328_v52 = vsel %vm2517_vm2, %v895_v31, 0.0  ;;  %v5435_v53 = vpop.f32.mrb[43].mxu1 }
 0x14a   : > { %v2867_v48 = vadd.f32 %v2866_v23, %v2865_v22  ;;  %v4091_v59 = vmax.f32 %v4089_v18, %v4090_v37  ;;  %v3329_v49 = vadd.f32 %v3328_v52, %v3327_v45  ;;  %v4552_v19 = vsel %vm2517_vm2, %v895_v31, -inf }
 0x14b   : > { %v871_v34 = vadd.f32 %v5963_v9, %v818_v58  ;;  %v843_v39 = vmul.f32 %v5961_v7, %v779_v47  ;;  %v3946_v62 = vrot.slane %v6259_v32, 1  ;;  %v4046_v63 = vmax.f32 %v3984_v8, %v4045_v36 }
 0x14c   : > { %v659_v2 = vpop.f32.mrb[44].mxu0  ;;  %v4553_v60 = vmax.f32 %v4551_v51, %v4552_v19  ;;  %v844_v41 = vmul.f32 %v5961_v7, %v784_v4  ;;  %v2822_v21 = vadd.f32 %v2821_v40, %v2760_v61  ;;  %v845_v29 = vmul.f32 %v5961_v7, %v789_v14 }
 0x14d   : > { %v2868_v5 = vsel %vm2517_vm2, %v871_v34, 0.0  ;;  %v4092_v12 = vsel %vm2517_vm2, %v871_v34, -inf  ;;  %v819_v13 = vmul.f32 %v5961_v7, %v659_v2  ;;  %v5357_v17 = vpop.f32.mrb[45].mxu0  ;;  %v896_v16 = vadd.f32 %v5963_v9, %v843_v39 }
 0x14e   : > { %v2869_v22 = vadd.f32 %v2868_v5, %v2867_v48  ;;  %v4093_v47 = vmax.f32 %v4091_v59, %v4092_v12  ;;  %v897_v18 = vadd.f32 %v5963_v9, %v844_v41  ;;  %v4047_v30 = vrot.slane %v4046_v63, 2 }
 0x14f   : > { %v872_v8 = vadd.f32 %v5963_v9, %v819_v13  ;;  %v3330_v4 = vsel %vm2517_vm2, %v896_v16, 0.0  ;;  %v4554_v28 = vsel %vm2517_vm2, %v896_v16, -inf  ;;  %v2618_v14 = vadd.f32 %v2617_v10, %v6161_v50 }
 0x150   : > { %v664_v31 = vpop.f32.mrb[46].mxu0  ;;  %v3331_v36 = vadd.f32 %v3330_v4, %v3329_v49  ;;  %v4555_v61 = vmax.f32 %v4553_v60, %v4554_v28  ;;  %v3332_v11 = vsel %vm2517_vm2, %v897_v18, 0.0  ;;  %v4556_v58 = vsel %vm2517_vm2, %v897_v18, -inf }
 0x151   : > { %v2870_v45 = vsel %vm2517_vm2, %v872_v8, 0.0  ;;  %v4094_v51 = vsel %vm2517_vm2, %v872_v8, -inf  ;;  %v820_v23 = vmul.f32 %v5961_v7, %v664_v31  ;;  %v5360_v37 = vpop.f32.mrb[47].mxu0  ;;  %v898_v59 = vadd.f32 %v5963_v9, %v845_v29 }
 0x152   : > { %v2871_v38 = vadd.f32 %v2870_v45, %v2869_v22  ;;  %v4095_v52 = vmax.f32 %v4093_v47, %v4094_v51  ;;  %v3333_v53 = vadd.f32 %v3332_v11, %v3331_v36  ;;  %v4557_v48 = vmax.f32 %v4555_v61, %v4556_v58 }
 0x153   : > { %v873_v40 = vadd.f32 %v5963_v9, %v820_v23  ;;  %v3844_v34 = vmax.f32 %v6222_v27, %v3843_v20  ;;  %v2720_v49 = vrot.slane %v6266_v57, 2  ;;  %v2823_v19 = vrot.slane %v2822_v21, 2 }
 0x154   : > { %v4048_v39 = vmax.f32 %v4046_v63, %v4047_v30  ;;  %v669_v2 = vpop.f32.mrb[48].mxu0  ;;  %v3947_v60 = vmax.f32 %v6259_v32, %v3946_v62  ;;  %v3334_v5 = vsel %vm2517_vm2, %v898_v59, 0.0  ;;  %vm4576_vm5 = vcmask 1042434  }
 0x155   : > { %v2872_v50 = vsel %vm2517_vm2, %v873_v40, 0.0  ;;  %v4096_v10 = vsel %vm2517_vm2, %v873_v40, -inf  ;;  %v821_v41 = vmul.f32 %v5961_v7, %v669_v2  ;;  %v5363_v12 = vpop.f32.mrb[49].mxu0  ;;  %v6303_v27 = vadd.f32 %v3334_v5, %v3333_v53 }
 0x156   : > { %v2873_v13 = vadd.f32 %v2872_v50, %v2871_v38  ;;  %v4097_v17 = vmax.f32 %v4095_v52, %v4096_v10  ;;  %v4558_v20 = vsel %vm2517_vm2, %v898_v59, -inf  ;;  %v2619_v63 = vrot.slane %v2618_v14, 1 }
 0x157   : > { %v6308_v32 = vsel %vm2517_vm2, %v6151_v33, -inf  ;;  %v874_v62 = vadd.f32 %v5963_v9, %v821_v41  ;;  %v6311_v16 = vmax.f32 %v4557_v48, %v4558_v20  ;;  %v2721_v22 = vadd.f32 %v2720_v49, %v6266_v57 }
 0x158   : > { %v2824_v47 = vadd.f32 %v2823_v19, %v2822_v21  ;;  %v674_v18 = vpop.f32.mrb[50].mxu0  ;;  %v4049_v8 = vrot.slane %v4048_v39, 1  ;;  %v4597_v4 = vsel %vm4574_vm15, %v3947_v60, %v3844_v34  ;;  %v6317_v28 = vsel %vm2517_vm2, %v6176_v55, 0.0 }
 0x159   : > { %v2296_v29 = vsel %vm1512_vm1, %v874_v62, 0.0  ;;  %v3521_v33 = vsel %vm1512_vm1, %v874_v62, -inf  ;;  %v822_v30 = vmul.f32 %v5961_v7, %v674_v18  ;;  %v5366_v31 = vpop.f32.mrb[51].mxu0  ;;  %v6326_v57 = vsel %vm2517_vm2, %v6176_v55, -inf }
 0x15a   : > { %v2874_v21 = vsel %vm2517_vm2, %v2296_v29, 0.0  ;;  %v4098_v36 = vsel %vm2517_vm2, %v3521_v33, -inf  ;;  %v2345_v61 = vsel %vm1169_vm4, %v874_v62, 0.0  ;;  %v2620_v11 = vadd.f32 %v2619_v63, %v2618_v14 }
 0x15b   : > { %v2875_v45 = vadd.f32 %v2874_v21, %v2873_v13  ;;  %v4099_v51 = vmax.f32 %v4097_v17, %v4098_v36  ;;  %v875_v23 = vadd.f32 %v5963_v9, %v822_v30  ;;  %v2722_v37 = vrot.slane %v2721_v22, 1 }
 0x15c   : > { %v2825_v58 = vrot.slane %v2824_v47, 1  ;;  %v3570_v38 = vsel %vm1169_vm4, %v874_v62, -inf  ;;  %v679_v52 = vpop.f32.mrb[52].mxu0  ;;  %v4050_v55 = vmax.f32 %v4048_v39, %v4049_v8  ;;  %v2977_v48 = vsel %vm2517_vm2, %v2345_v61, 0.0 }
 0x15d   : > { %v2924_v53 = vrot.slane %v2875_v45, 4  ;;  %v4148_v40 = vrot.slane %v4099_v51, 4  ;;  %v2979_v59 = vsel %vm2517_vm2, %v875_v23, 0.0  ;;  %v5369_v34 = vpop.f32.mrb[53].mxu0  ;;  %v4201_v14 = vsel %vm2517_vm2, %v3570_v38, -inf }
 0x15e   : > { %v2980_v49 = vadd.f32 %v2979_v59, %v2977_v48  ;;  %v4203_v19 = vsel %vm2517_vm2, %v875_v23, -inf  ;;  %v823_v2 = vmul.f32 %v5961_v7, %v679_v52  ;;  %vm4578_vm6 = vcmask 1043459  }
 0x15f   : > { %v3576_v42 = vsel %vm1567_vm3, %v5991_v46, -inf  ;;  %v2925_v39 = vadd.f32 %v2924_v53, %v2875_v45  ;;  %v4149_v60 = vmax.f32 %v4099_v51, %v4148_v40  ;;  %v4204_v50 = vmax.f32 %v4201_v14, %v4203_v19 }
 0x160   : > { %v2989_v10 = vsel %vm2517_vm2, %v6001_v56, 0.0  ;;  %v2723_v41 = vadd.f32 %v2722_v37, %v2721_v22  ;;  %v876_v5 = vadd.f32 %v5963_v9, %v823_v2  ;;  %v4598_v12 = vsel %vm4576_vm5, %v4050_v55, %v4597_v4 }
 0x161   : > { %v3342_v13 = vmul.f32 0.020408163, %v2620_v11  ;;  %v3130_v17 = vrot.slane %v6094_v25, 4  ;;  %v2926_v7 = vrot.slane %v2925_v39, 2  ;;  %v4150_v20 = vrot.slane %v4149_v60, 2 }
 0x162   : > { %v3233_v63 = vrot.slane %v6215_v15, 4  ;;  %v2826_v35 = vadd.f32 %v2825_v58, %v2824_v47  ;;  %v2981_v46 = vsel %vm2517_vm2, %v876_v5, 0.0  ;;  %v4205_v62 = vsel %vm2517_vm2, %v876_v5, -inf }
 0x163   : > { %v2927_v18 = vadd.f32 %v2926_v7, %v2925_v39  ;;  %v2982_v8 = vadd.f32 %v2981_v46, %v2980_v49  ;;  %v4206_v56 = vmax.f32 %v4204_v50, %v4205_v62  ;;  %v4151_v22 = vmax.f32 %v4149_v60, %v4150_v20 }
 0x164   : > { %v4354_v9 = vrot.slane %v6096_v26, 4  ;;  %v3343_v29 = vmul.f32 0.020408163, %v2723_v41  ;;  %v3336_v4 = vrot.slane %v6303_v27, 4  ;;  %v4457_v33 = vrot.slane %v6218_v24, 4 }
 0x165   : > { %v2928_v30 = vrot.slane %v2927_v18, 1  ;;  %v2984_v31 = vadd.f32 %v6110_v43, %v2982_v8  ;;  %v4208_v47 = vmax.f32 %v4206_v56, %v6113_v44  ;;  %v4152_v21 = vrot.slane %v4151_v22, 1 }
 0x166   : > { %v3131_v36 = vadd.f32 %v3130_v17, %v6094_v25  ;;  %v3234_v61 = vadd.f32 %v3233_v63, %v6215_v15  ;;  %v3344_v11 = vmul.f32 0.020408163, %v2826_v35  ;;  %v4560_v45 = vrot.slane %v6311_v16, 4 }
 0x167   : > { %v2986_v51 = vadd.f32 %v6173_v54, %v2984_v31  ;;  %v4210_v23 = vmax.f32 %v4208_v47, %v6308_v32  ;;  %v4153_v37 = vmax.f32 %v4151_v22, %v4152_v21  ;;  %v2929_v58 = vadd.f32 %v2928_v30, %v2927_v18 }
 0x168   : > { %v3337_v38 = vadd.f32 %v3336_v4, %v6303_v27  ;;  %v4355_v43 = vmax.f32 %v6096_v26, %v4354_v9  ;;  %v4458_v44 = vmax.f32 %v6218_v24, %v4457_v33  ;;  %v4575_v52 = vsel %vm4574_vm15, %v3343_v29, %v3342_v13 }
 0x169   : > { %v2988_v25 = vadd.f32 %v6317_v28, %v2986_v51  ;;  %v4212_v15 = vmax.f32 %v4210_v23, %v6326_v57  ;;  %v4599_v55 = vsel %vm4578_vm6, %v4153_v37, %v4598_v12  ;;  %v3345_v53 = vmul.f32 0.020408163, %v2929_v58 }
 0x16a   : > { %v4213_v54 = vsel %vm2517_vm2, %v3576_v42, -inf  ;;  %v3132_v32 = vrot.slane %v3131_v36, 2  ;;  %v4561_v40 = vmax.f32 %v6311_v16, %v4560_v45  ;;  %v4577_v27 = vsel %vm4576_vm5, %v3344_v11, %v4575_v52 }
 0x16b   : > { %v2990_v48 = vadd.f32 %v2989_v10, %v2988_v25  ;;  %v4214_v26 = vmax.f32 %v4212_v15, %v4213_v54  ;;  %v3235_v59 = vrot.slane %v3234_v61, 2  ;;  %v4579_v24 = vsel %vm4578_vm6, %v3345_v53, %v4577_v27  ;;  %v4633_v15 = vld [vmem:[%s6484_s3] sm:$0xff] }
 0x16c   : > { %v3338_v34 = vrot.slane %v3337_v38, 2  ;;  %v4356_v49 = vrot.slane %v4355_v43, 2  ;;  %v4459_v57 = vrot.slane %v4458_v44, 2  ;;  %v4562_v19 = vrot.slane %v4561_v40, 2 }
 0x16d   : > { %v3027_v28 = vrot.slane %v2990_v48, 4  ;;  %v4251_v14 = vrot.slane %v4214_v26, 4  ;;  %v3133_v2 = vadd.f32 %v3132_v32, %v3131_v36  ;;  %v3236_v42 = vadd.f32 %v3235_v59, %v3234_v61 }
 0x16e   : > { %v3339_v50 = vadd.f32 %v3338_v34, %v3337_v38  ;;  %v4357_v41 = vmax.f32 %v4355_v43, %v4356_v49  ;;  %v4460_v12 = vmax.f32 %v4458_v44, %v4459_v57  ;;  %v4563_v10 = vmax.f32 %v4561_v40, %v4562_v19 }
 0x16f   : > { %v3028_v39 = vadd.f32 %v3027_v28, %v2990_v48  ;;  %v4252_v60 = vmax.f32 %v4214_v26, %v4251_v14  ;;  %v3134_v13 = vrot.slane %v3133_v2, 1  ;;  %v3237_v20 = vrot.slane %v3236_v42, 1  ;;  %v6393_v28 = vld [vmem:[%s6483_s2] sm:$0xff] }
 0x170   : > { %v4358_v63 = vrot.slane %v4357_v41, 1  ;;  %v3340_v35 = vrot.slane %v3339_v50, 1  ;;  %v4461_v62 = vrot.slane %v4460_v12, 1  ;;  %v4564_v8 = vrot.slane %v4563_v10, 1 }
 0x171   : > { %v3029_v16 = vrot.slane %v3028_v39, 2  ;;  %v4253_v5 = vrot.slane %v4252_v60, 2  ;;  %vm4580_vm3 = vcmask 1044484   ;;  %v3135_v56 = vadd.f32 %v3134_v13, %v3133_v2 }
 0x172   : > { %vm4582_vm7 = vcmask 1045509   ;;  %v3238_v29 = vadd.f32 %v3237_v20, %v3236_v42  ;;  %v4359_v4 = vmax.f32 %v4357_v41, %v4358_v63  ;;  %vm4584_vm8 = vcmask 1046534   ;;  %v4751_v42 = vld [vmem:[%s6485_s4 + $0x8] sm:$0xff] }
 0x173   : > { %v4254_v17 = vmax.f32 %v4252_v60, %v4253_v5  ;;  %v3030_v7 = vadd.f32 %v3029_v16, %v3028_v39  ;;  %v3341_v33 = vadd.f32 %v3340_v35, %v3339_v50  ;;  %v4462_v30 = vmax.f32 %v4460_v12, %v4461_v62  ;;  %v4750_v60 = vld [vmem:[%s6485_s4] sm:$0xff] }
 0x174   : > { %vm4586_vm9 = vcmask 1047559   ;;  %v4565_v21 = vmax.f32 %v4563_v10, %v4564_v8  ;;  %v3347_v61 = vmul.f32 0.020408163, %v3135_v56  ;;  %v3348_v45 = vmul.f32 0.020408163, %v3238_v29 }
 0x175   : > { %v4255_v46 = vrot.slane %v4254_v17, 1  ;;  %v3031_v18 = vrot.slane %v3030_v7, 1  ;;  %v3349_v37 = vmul.f32 0.020408163, %v3341_v33  ;;  %vm4608_vm10 = vcmask 130048  }
 0x176   : > { %v4625_v34 = vsub.s32 2, %v5954_v1  ;;  %v4630_v49 = vsub.s32 3, %v5954_v1  ;;  %v5476_v50 = vpack.c.bf16 %v4751_v42, %v4750_v60  ;;  %v4637_v41 = vsub.s32 4, %v5954_v1 }
 0x177   : > { %v4256_v22 = vmax.f32 %v4254_v17, %v4255_v46  ;;  %v3032_v9 = vadd.f32 %v3031_v18, %v3030_v7  ;;  %vm4739_vm12 = vcmask 130112   ;;  %vm4970_vm14 = vcmask 1043456  }
 0x178   : > { %v4631_v57 = vrot.slane %v6393_v28, %v4630_v49  ;;  %v4638_v16 = vrot.slane %v6393_v28, %v4637_v41  ;;  %vm4966_vm15 = vcmask 31744   ;;  %vm5071_vm4 = vcmask 57344  }
 0x179   : > { %v4600_v31 = vsel %vm4580_vm3, %v4256_v22, %v4599_v55  ;;  %v3346_v47 = vmul.f32 0.020408163, %v3032_v9  ;;  %v4634_v55 = vld [vmem:[%s6484_s3 + $0x8] sm:$0xff] }
 0x17a   : > { %v4601_v36 = vsel %vm4582_vm7, %v4359_v4, %v4600_v31  ;;  %v5473_v53 = vpack.c.bf16 %v4634_v55, %v4633_v15  ;;  %v4856_v55 = vld [vmem:[%s6486_s5] sm:$0xff] }
 0x17b   : > { %v4602_v11 = vsel %vm4584_vm8, %v4462_v30, %v4601_v36  ;;  %v4581_v51 = vsel %vm4580_vm3, %v3346_v47, %v4579_v24 }
 0x17c   : > { %v4603_v23 = vsel %vm4586_vm9, %v4565_v21, %v4602_v11  ;;  %v4583_v58 = vsel %vm4582_vm7, %v3347_v61, %v4581_v51  ;;  %5474 = vmatpush3.bf16.msra.mxu1 %v5473_v53  ;;  %v4754_v53 = vsub.s32 5, %v5954_v1 }
 0x17d   : > { %4604 = vrot.lane.b32.xlu0 %v4603_v23, %s5619_s29  ;;  %v4585_v38 = vsel %vm4584_vm8, %v3348_v45, %v4583_v58  ;;  %5475 = vmatprep.subr.bf16.mxu1 %v5616_v3  ;;  %v4626_v3 = vrot.slane %v6393_v28, %v4625_v34 }
 0x17e   : > { %v4587_v43 = vsel %vm4586_vm9, %v3349_v37, %v4585_v38 }
 0x1ef   : > { %v4605_v44 = vpop.permute.xlu0 %4604 }
 0x1f0   : > { %v4607_v52 = vsel %vm2517_vm2, %v4587_v43, %v4605_v44 }
 0x1f1   : > { %v4609_v25 = vsel %vm4608_vm10, %v4607_v52, 0.0 }
 0x1f2   : > { %4610 = vadd.xlane.f32.xlu0 %v4609_v25 }
 0x27f   : > { %v4611_v54 = vpop.xlane.xlu0 %4610 }
 0x280   : > { %v4613_v32 = vmul.f32 0.0625, %v4611_v54  ;;  %v4755_v54 = vrot.slane %v6393_v28, %v4754_v53  ;;  %v5620_v53 = vmov 0  }
 0x281   : > { %5533 = vset.pattern.permute.xlu1 %v5620_v53  ;;  %5534 = vset.pattern.permute.xlu0 %v5620_v53 }
 0x282   : > { %v4614_v40 = vsub.f32 %v4607_v52, %v4613_v32 }
 0x284   : > { %v4615_v27 = vmul.f32 %v4614_v40, %v4614_v40 }
 0x286   : > { %v4616_v48 = vsel %vm4608_vm10, %v4615_v27, 0.0 }
 0x287   : > { %4617 = vadd.xlane.f32.xlu1 %v4616_v48 }
 0x314   : > { %v4618_v26 = vpop.xlane.xlu1 %4617 }
 0x315   : > { %v4619_v59 = vmul.f32 0.0625, %v4618_v26 }
 0x317   : > { %v4620_v24 = vadd.f32 1e-05, %v4619_v59 }
 0x319   : > { %5535 = vrsqrt.f32 %v4620_v24 }
 0x323   : > { %v5536_v14 = vpop.eup %5535 }
 0x324   : > { %v4622_v19 = vmul.f32 %v5536_v14, %v4614_v40 }
 0x326   : > { %v4627_v2 = vmul.f32 %v4626_v3, %v4622_v19 }
 0x328   : > { %v4632_v39 = vadd.f32 %v4631_v57, %v4627_v2 }
 0x32a   : > { %5441 = vmatmul.mubr.msk.f32.vlgmr.msra.gmra.mrb[44].mxu1 %vm4608_vm10, %v4632_v39 }
 0x32b   : > { %5447 = vmatprep.mubr.msk.f32.mxu1 %vm5617_vm0, %v5618_v6  ;;  %5477 = vmatpush3.bf16.msra.mxu1 %v5476_v50 }
 0x32c   : > { %5450 = vmatprep.subr.mxu1 %v5618_v6 }
 0x3fd   : > { %v4708_v5 = vpop.f32.mrb[44].mxu1 }
 0x3fe   : > { %v4709_v12 = vadd.f32 %v4708_v5, %v4638_v16  ;;  %v5442_v10 = vpop.f32.mrb[45].mxu1 }
 0x400   : > { %v4713_v13 = vmul.f32 0.70710677, %v4709_v12  ;;  %v4712_v11 = vmul.f32 0.5, %v4709_v12 }
 0x402   : > { %v4714_v17 = vand.u32 2147483647, %v4713_v13  ;;  %vm4734_vm11 = vcmp.ge.f32.partialorder %v4713_v13, 0.0 }
 0x404   : > { %v4715_v7 = vmul.f32 0.3275911, %v4714_v17  ;;  %v4728_v63 = vsub.f32 0.0, %v4714_v17 }
 0x406   : > { %v4716_v20 = vadd.f32 1.0, %v4715_v7  ;;  %v4729_v46 = vmul.f32 %v4728_v63, %v4714_v17 }
 0x408   : > { %5537 = vrcp.f32 %v4716_v20  ;;  %v4730_v8 = vmul.f32 1.442695, %v4729_v46  ;;  %v4859_v46 = vsub.s32 6, %v5954_v1 }
 0x40a   : > { %5539 = vpow2.f32 %v4730_v8 }
 0x412   : > { %v5538_v35 = vpop.eup %5537 }
 0x413   : > { %v4719_v62 = vmul.f32 1.0614054, %v5538_v35 }
 0x414   : > { %v5540_v31 = vpop.eup %5539 }
 0x415   : > { %v4720_v18 = vadd.f32 -1.4531521, %v4719_v62  ;;  %v4860_v62 = vrot.slane %v6393_v28, %v4859_v46 }
 0x417   : > { %v4721_v56 = vmul.f32 %v5538_v35, %v4720_v18 }
 0x419   : > { %v4722_v22 = vadd.f32 1.4214138, %v4721_v56 }
 0x41b   : > { %v4723_v9 = vmul.f32 %v5538_v35, %v4722_v22 }
 0x41d   : > { %v4724_v29 = vadd.f32 -0.28449672, %v4723_v9 }
 0x41f   : > { %v4725_v4 = vmul.f32 %v5538_v35, %v4724_v29 }
 0x421   : > { %v4726_v33 = vadd.f32 0.2548296, %v4725_v4 }
 0x423   : > { %v4727_v30 = vmul.f32 %v5538_v35, %v4726_v33  ;;  %v4961_v35 = vld [vmem:[%s6487_s6] sm:$0xf] }
 0x425   : > { %v4732_v47 = vmul.f32 %v5540_v31, %v4727_v30 }
 0x427   : > { %v4733_v21 = vsub.f32 1.0, %v4732_v47 }
 0x429   : > { %v4735_v36 = vsub.f32 0.0, %v4733_v21 }
 0x42b   : > { %v4736_v61 = vsel %vm4734_vm11, %v4733_v21, %v4735_v36 }
 0x42c   : > { %v4737_v45 = vadd.f32 1.0, %v4736_v61 }
 0x42e   : > { %v4738_v51 = vmul.f32 %v4737_v45, %v4712_v11 }
 0x430   : > { %v4740_v23 = vsel %vm4739_vm12, %v4738_v51, 0.0 }
 0x431   : > { %v4741_v37 = vrot.slane %v4740_v23, 4 }
 0x433   : > { %v4742_v58 = vadd.f32 %v4741_v37, %v4740_v23 }
 0x435   : > { %v4743_v38 = vrot.slane %v4742_v58, 2 }
 0x437   : > { %v4744_v43 = vadd.f32 %v4743_v38, %v4742_v58 }
 0x439   : > { %v4745_v44 = vrot.slane %v4744_v43, 1 }
 0x43b   : > { %v4746_v52 = vadd.f32 %v4745_v44, %v4744_v43 }
 0x43d   : > { %v4748_v25 = vmul.f32 0.125, %v4746_v52 }
 0x43f   : > { %v4749_v15 = vsel %vm2517_vm2, %v4738_v51, %v4748_v25 }
 0x440   : > { %5448 = vmatmul.mubr.msk.f32.vlgmr.msra.gmra.mrb[46].mxu1 %vm4608_vm10, %v4749_v15 }
 0x441   : > { %5452 = vmatprep.mubr.msk.f32.mxu1 %vm5617_vm0, %v5618_v6  ;;  %5451 = vmatpush3.msra.mxu1 %v4856_v55 }
 0x442   : > { %5455 = vmatprep.subr.mxu1 %v5618_v6 }
 0x513   : > { %v4825_v32 = vpop.f32.mrb[46].mxu1 }
 0x514   : > { %v4826_v40 = vadd.f32 %v4825_v32, %v4755_v54  ;;  %v5449_v27 = vpop.f32.mrb[47].mxu1  ;;  %v4964_v54 = vsub.s32 7, %v5954_v1 }
 0x516   : > { %v4830_v48 = vmul.f32 0.70710677, %v4826_v40  ;;  %v4829_v7 = vmul.f32 0.5, %v4826_v40  ;;  %v4965_v32 = vrot.slane %v6393_v28, %v4964_v54 }
 0x518   : > { %v4831_v26 = vand.u32 2147483647, %v4830_v48  ;;  %vm4851_vm13 = vcmp.ge.f32.partialorder %v4830_v48, 0.0 }
 0x51a   : > { %v4832_v59 = vmul.f32 0.3275911, %v4831_v26  ;;  %v4845_v34 = vsub.f32 0.0, %v4831_v26 }
 0x51c   : > { %v4833_v24 = vadd.f32 1.0, %v4832_v59  ;;  %v4846_v3 = vmul.f32 %v4845_v34, %v4831_v26  ;;  %v5045_v26 = vand.u32 127, %v793_v0 }
 0x51e   : > { %5541 = vrcp.f32 %v4833_v24  ;;  %v4847_v19 = vmul.f32 1.442695, %v4846_v3  ;;  %vm5046_vm1 = vcmp.eq.s32.totalorder %v5954_v1, %v5045_v26 }
 0x520   : > { %5543 = vpow2.f32 %v4847_v19 }
 0x528   : > { %v5542_v49 = vpop.eup %5541 }
 0x529   : > { %v4836_v14 = vmul.f32 1.0614054, %v5542_v49 }
 0x52a   : > { %v5544_v5 = vpop.eup %5543 }
 0x52b   : > { %v4837_v57 = vadd.f32 -1.4531521, %v4836_v14 }
 0x52d   : > { %v4838_v2 = vmul.f32 %v5542_v49, %v4837_v57 }
 0x52f   : > { %v4839_v39 = vadd.f32 1.4214138, %v4838_v2 }
 0x531   : > { %v4840_v60 = vmul.f32 %v5542_v49, %v4839_v39 }
 0x533   : > { %v4841_v42 = vadd.f32 -0.28449672, %v4840_v60 }
 0x535   : > { %v4842_v50 = vmul.f32 %v5542_v49, %v4841_v42 }
 0x537   : > { %v4843_v41 = vadd.f32 0.2548296, %v4842_v50 }
 0x539   : > { %v4844_v16 = vmul.f32 %v5542_v49, %v4843_v41 }
 0x53b   : > { %v4849_v12 = vmul.f32 %v5544_v5, %v4844_v16 }
 0x53d   : > { %v4850_v10 = vsub.f32 1.0, %v4849_v12 }
 0x53f   : > { %v4852_v13 = vsub.f32 0.0, %v4850_v10 }
 0x541   : > { %v4853_v17 = vsel %vm4851_vm13, %v4850_v10, %v4852_v13 }
 0x542   : > { %v4854_v20 = vadd.f32 1.0, %v4853_v17 }
 0x544   : > { %v4855_v63 = vmul.f32 %v4854_v20, %v4829_v7 }
 0x546   : > { %5453 = vmatmul.mubr.msk.f32.vlgmr.msra.gmra.mrb[48].mxu1 %vm2517_vm2, %v4855_v63 }
 0x547   : > { %5457 = vmatprep.mubr.msk.f32.mxu1 %vm5617_vm0, %v5618_v6  ;;  %5456 = vmatpush3.msk.msra.mxu1 %vm4970_vm14, %v4961_v35 }
 0x619   : > { %v4930_v18 = vpop.f32.mrb[48].mxu1 }
 0x61a   : > { %v4931_v8 = vadd.f32 %v4930_v18, %v4860_v62  ;;  %v5454_v56 = vpop.f32.mrb[49].mxu1 }
 0x61c   : > { %v4935_v22 = vmul.f32 0.70710677, %v4931_v8  ;;  %v4934_v25 = vmul.f32 0.5, %v4931_v8 }
 0x61e   : > { %v4936_v9 = vand.u32 2147483647, %v4935_v22  ;;  %vm4956_vm0 = vcmp.ge.f32.partialorder %v4935_v22, 0.0 }
 0x620   : > { %v4937_v29 = vmul.f32 0.3275911, %v4936_v9  ;;  %v4950_v33 = vsub.f32 0.0, %v4936_v9 }
 0x622   : > { %v4938_v4 = vadd.f32 1.0, %v4937_v29  ;;  %v4951_v30 = vmul.f32 %v4950_v33, %v4936_v9 }
 0x624   : > { %5545 = vrcp.f32 %v4938_v4  ;;  %v4952_v21 = vmul.f32 1.442695, %v4951_v30 }
 0x626   : > { %5547 = vpow2.f32 %v4952_v21 }
 0x62e   : > { %v5546_v6 = vpop.eup %5545 }
 0x62f   : > { %v4941_v31 = vmul.f32 1.0614054, %v5546_v6 }
 0x630   : > { %v5548_v58 = vpop.eup %5547 }
 0x631   : > { %v4942_v47 = vadd.f32 -1.4531521, %v4941_v31 }
 0x633   : > { %v4943_v36 = vmul.f32 %v5546_v6, %v4942_v47 }
 0x635   : > { %v4944_v61 = vadd.f32 1.4214138, %v4943_v36 }
 0x637   : > { %v4945_v11 = vmul.f32 %v5546_v6, %v4944_v61 }
 0x639   : > { %v4946_v45 = vadd.f32 -0.28449672, %v4945_v11 }
 0x63b   : > { %v4947_v51 = vmul.f32 %v5546_v6, %v4946_v45 }
 0x63d   : > { %v4948_v23 = vadd.f32 0.2548296, %v4947_v51 }
 0x63f   : > { %v4949_v37 = vmul.f32 %v5546_v6, %v4948_v23 }
 0x641   : > { %v4954_v38 = vmul.f32 %v5548_v58, %v4949_v37 }
 0x643   : > { %v4955_v43 = vsub.f32 1.0, %v4954_v38 }
 0x645   : > { %v4957_v44 = vsub.f32 0.0, %v4955_v43 }
 0x647   : > { %v4958_v52 = vsel %vm4956_vm0, %v4955_v43, %v4957_v44 }
 0x648   : > { %v4959_v15 = vadd.f32 1.0, %v4958_v52 }
 0x64a   : > { %v4960_v55 = vmul.f32 %v4959_v15, %v4934_v25 }
 0x64c   : > { %5458 = vmatmul.mubr.msk.f32.vlgmr.msra.gmra.mrb[50].mxu1 %vm4966_vm15, %v4960_v55 }
 0x71f   : > { %v5040_v40 = vpop.f32.mrb[50].mxu1 }
 0x720   : > { %v5041_v27 = vadd.f32 %v5040_v40, %v4965_v32  ;;  %v5459_v48 = vpop.f32.mrb[51].mxu1 }
 0x722   : > { %5049 = vperm.xlu1 %5533, %v5041_v27  }
 0x7a1   : > { %v5050_v59 = vpop.permute.xlu1 %5049 }
 0x7a2   : > { %v5052_v24 = vsel %vm5046_vm1, %v5050_v59, 0.0 }
 0x7a3   : > { %v5053_v34 = vsel %vm2517_vm2, %v5052_v24, 0.0 }
 0x7a4   : > { %v5054_v49 = vrot.slane %v5053_v34, 4 }
 0x7a6   : > { %v5055_v3 = vadd.f32 %v5054_v49, %v5053_v34 }
 0x7a8   : > { %v5056_v14 = vrot.slane %v5055_v3, 2 }
 0x7aa   : > { %v5057_v57 = vadd.f32 %v5056_v14, %v5055_v3 }
 0x7ac   : > { %v5058_v19 = vrot.slane %v5057_v57, 1 }
 0x7ae   : > { %v5059_v28 = vadd.f32 %v5058_v19, %v5057_v57 }
 0x7b0   : > { %v5063_v2 = vsel %vm2517_vm2, %v5059_v28, -inf  ;;  %v5060_v39 = vsel %vm2517_vm2, %v5059_v28, inf }
 0x7b1   : > { %5064 = vmax.xlane.f32.xlu0 %v5063_v2  ;;  %5061 = vmin.xlane.f32.xlu1 %v5060_v39 }
 0x83e   : > { %v5065_v0 = vpop.xlane.xlu0 %5064  ;;  %v5062_v1 = vpop.xlane.xlu1 %5061 }
 0x83f   : > { %v5067_v60 = vsub.f32 %v5065_v0, %v5062_v1  ;;  %v5066_v50 = vsub.f32 %v5059_v28, %v5062_v1 }
 0x841   : > { %v5068_v42 = vadd.f32 1e-05, %v5067_v60 }
 0x843   : > { %5549 = vrcp.f32 %v5068_v42 }
 0x84d   : > { %v5550_v41 = vpop.eup %5549 }
 0x84e   : > { %v5070_v16 = vmul.f32 %v5550_v41, %v5066_v50 }
 0x850   : > { %5072 = vst.msk [vmem:[%s270_s13] sm:$0x1] %vm5071_vm4, %v5070_v16 }
 0x851   : > { %5565 = shalt.err (!%p5562_p3)
}
 0x852   : > { %s5566_s22 = scalar_lea.hbm %s6439_s17, 16  ;;  %s5570_s8 = scalar_lea.hbm %s6488_s7, 32 }
 0x853   : > { %p5567_p4 = scmp.ne.s32.totalorder %s6439_s17, %s5566_s22  ;;  %p5571_p9 = scmp.lt.u32.totalorder %s6439_s17, %s6488_s7 }
 0x854   : > { %p5572_p10 = scmp.lt.u32.totalorder %s5570_s8, %s5566_s22  ;;  %p5574_p12 = scmp.lt.u32.totalorder %s5566_s22, %s6439_s17 }
 0x855   : > { %p5568_p7 = pnand %p5567_p4, %p5700_p5 }
 0x856   : > { %p5573_p11 = por %p5572_p10, %p5571_p9 }
 0x857   : > { %p5569_p8 = pneg %p5568_p7 }
 0x858   : > { %p5575_p13 = por %p5574_p12, %p5573_p11 }
 0x85a   : > { %p5576_p0 = pnand %p5575_p13, %p5569_p8 }
 0x85c   : > { %5579 = shalt.err (!%p5576_p0)
}
 0x85d   : > { %5489 = dma.vmem_to_hbm [thread:$0]  (%p5700_p5), %s6441_s14, 16, %s6439_s17, %s5074_s18  }
 0x85e PF: > { %p5495_p1 = scmp.ge.s32.totalorder %s5614_s27, 2  ;;  %s5098_s15 = sand.u32 1, %s5602_s24  }
 0x85f   : > { %s5099_s16 = scalar_lea.sflag [#allocation3], %s5098_s15 }
 0x860   : > { %p5492_p2 = pnand %p5495_p1, %p5704_p6 }
 0x862   : > { %5597 = dma.done.wait (!%p5492_p2), %s5099_s16, 16  }
 0x863   : > { %5599 = vsyncadd (!%p5492_p2), %s5099_s16, 4294967280  ;;  %p17_p3 = scmp.ge.s32.totalorder %s5687_s30, 4   ;;  %s6491_s24 = smov %s5606_s25 }
 0x864   : > { %s6492_s25 = smov %s5610_s26  ;;  %s6493_s26 = smov %s5698_s10 }
 0x865   : > { %s6494_s27 = smov %s5687_s30  ;;  %19 = sbr.rel (!%p17_p3) target bundleno = 3 (0x3), region = 83 }
 0x86c   :  { %5103 = vsyncpa [#allocation3], 1 }
 0x86d   :  { %5105 = vsyncpa [#allocation3 + $0x1], 1 }

</bundles_post_ra>
